<compile_context>
chip_gen: v7x
topology: tpu7x:2x2x1
jax: 0.10.0
libtpu: 0.0.40
codegen_flags: <defaults>
</compile_context>

<pallas_src>
import jax
import jax.numpy as jnp
from jax import lax
from jax.experimental import pallas as pl
from jax.experimental.pallas import tpu as pltpu

_LANE = 128
_SUBLANE = 16                  # bf16 sublane packing
_NEG_INF = -1e30
_EPS2 = 1e-24                  # (F.normalize default eps = 1e-12) ** 2


def _round_up(x, m):
    return (x + m - 1) // m * m


def _vmem_budget_bytes():
    """Physical VMEM minus headroom (v7x: 64 MiB -> ~48; v5e/v6e: 128 -> ~96)."""
    try:
        cap = int(pltpu.get_tpu_info().vmem_capacity_bytes)
    except Exception:
        cap = 64 * 2 ** 20                      # conservative (v7x-sized) fallback
    headroom = 16 * 2 ** 20 if cap <= 96 * 2 ** 20 else 32 * 2 ** 20
    return max(cap - headroom, 16 * 2 ** 20)


def _fused_vmem_bytes(n, cp):
    """Rough per-step VMEM for the fused whole-N path (blocks + temporaries)."""
    blocks = 4 * n * cp * 2 + 4 * cp * cp * 2 + cp * cp * 4 + 4 * cp * 4
    temps = 22 * n * cp + 10 * cp * cp
    return blocks + temps


def _tiled_vmem_bytes(tn, cp):
    """Rough per-step VMEM for the N-tiled path (worst of pass 1 / pass 2)."""
    blocks = 4 * tn * cp * 2 + 4 * cp * cp * 2 + 2 * cp * cp * 4 + 2 * cp * cp * 2
    temps = 16 * tn * cp + 8 * cp * cp
    return blocks + temps


# ---------------------------------------------------------------------------
# Kernels
# ---------------------------------------------------------------------------
def _xca_fused_kernel(x_ref, wq_ref, wk_ref, wv_ref, wproj_ref, bproj_ref,
                      temp_ref, mask_ref, o_ref):
    """Single-pass whole-N XCA for one batch element, all heads fused."""
    x = x_ref[0]                                               # (Np, Cp) bf16

    # q/k projections as separate (Np, Cp) MXU matmuls (no (Np, 3Cp) f32 slab).
    q = jnp.dot(x, wq_ref[...], preferred_element_type=jnp.float32)
    k = jnp.dot(x, wk_ref[...], preferred_element_type=jnp.float32)

    # Per-channel L2 norm over tokens (f32 math, EUP rsqrt).
    q_inv = lax.rsqrt(jnp.maximum(jnp.sum(q * q, axis=0, keepdims=True), _EPS2))
    k_inv = lax.rsqrt(jnp.maximum(jnp.sum(k * k, axis=0, keepdims=True), _EPS2))
    qn = (q * q_inv).astype(jnp.bfloat16)
    kn = (k * k_inv).astype(jnp.bfloat16)

    # Transposed cross-covariance Gram for all heads at once:
    #   gram_t[j, i] = sum_n kn[n, j] * qn[n, i].
    gram_t = lax.dot_general(kn, qn, (((0,), (0,)), ((), ())),
                             preferred_element_type=jnp.float32)

    # Precomputed block-diagonal head mask (additive -inf) + per-channel
    # temperature, then softmax over j (sublane axis of the transposed gram).
    logits = gram_t * temp_ref[...] + mask_ref[...]
    logits = logits - jnp.max(logits, axis=0, keepdims=True)
    p = jnp.exp(logits)
    attn_t = (p * pl.reciprocal(jnp.sum(p, axis=0, keepdims=True), approx=True)
              ).astype(jnp.bfloat16)
    # attn_drop / proj_drop have p = 0.0 -> identity (eval semantics).

    # Weighted channel sum + output projection, all MXU-native (M,K)x(K,N).
    v = jnp.dot(x, wv_ref[...], preferred_element_type=jnp.float32).astype(jnp.bfloat16)
    y = jnp.dot(v, attn_t, preferred_element_type=jnp.float32)
    y = jnp.dot(y.astype(jnp.bfloat16), wproj_ref[...],
                preferred_element_type=jnp.float32)
    o_ref[0] = (y + bproj_ref[...]).astype(o_ref.dtype)


def _xca_gram_kernel(x_ref, wq_ref, wk_ref, gram_ref, qss_ref, kss_ref):
    """Tiled pass 1: accumulate raw transposed Gram + per-channel q/k sumsq."""
    @pl.when(pl.program_id(1) == 0)
    def _():
        gram_ref[...] = jnp.zeros_like(gram_ref)
        qss_ref[...] = jnp.zeros_like(qss_ref)
        kss_ref[...] = jnp.zeros_like(kss_ref)

    x = x_ref[0]                                               # (tn, Cp) bf16
    q = jnp.dot(x, wq_ref[...], preferred_element_type=jnp.float32)
    k = jnp.dot(x, wk_ref[...], preferred_element_type=jnp.float32)
    qss_ref[0] += jnp.sum(q * q, axis=0, keepdims=True)
    kss_ref[0] += jnp.sum(k * k, axis=0, keepdims=True)
    gram_ref[0] += lax.dot_general(k.astype(jnp.bfloat16), q.astype(jnp.bfloat16),
                                   (((0,), (0,)), ((), ())),
                                   preferred_element_type=jnp.float32)


def _xca_out_kernel(x_ref, wv_ref, attn_ref, wproj_ref, bproj_ref, o_ref):
    """Tiled pass 2: v = x Wv, y = v @ attn_T, out = y Wp + b."""
    x = x_ref[0]                                               # (tn, Cp) bf16
    v = jnp.dot(x, wv_ref[...], preferred_element_type=jnp.float32).astype(jnp.bfloat16)
    y = jnp.dot(v, attn_ref[0], preferred_element_type=jnp.float32)
    y = jnp.dot(y.astype(jnp.bfloat16), wproj_ref[...],
                preferred_element_type=jnp.float32)
    o_ref[0] = (y + bproj_ref[...]).astype(o_ref.dtype)


# ---------------------------------------------------------------------------
# Wrapper
# ---------------------------------------------------------------------------
def xca_prepare_params(wqkv_t, wproj_t, bproj, temperature, num_heads):
    """One-time parameter prep (hoisted out of the per-call path).

    Weights are pre-transposed to (in, out). Splits qkv into Wq/Wk/Wv, casts
    to bf16, zero-pads channels to a multiple of 128 (skipped when C%128==0),
    pre-expands the per-head temperature per channel and builds the additive
    block-diagonal head mask. Padded channels form all-zero "phantom heads"
    (C is a multiple of d, so they never share a head block with real
    channels) and therefore contribute exactly zero to real outputs.
    """
    C = wproj_t.shape[0]
    assert C % num_heads == 0
    d = C // num_heads
    cp = _round_up(C, _LANE)

    def _pad_w(w):
        w = w.astype(jnp.bfloat16)
        if cp != C:
            w = jnp.zeros((cp, cp), jnp.bfloat16).at[:C, :C].set(w)
        return w

    wq = _pad_w(wqkv_t[:, 0 * C:1 * C])
    wk = _pad_w(wqkv_t[:, 1 * C:2 * C])
    wv = _pad_w(wqkv_t[:, 2 * C:3 * C])
    wp = _pad_w(wproj_t)
    bp = jnp.zeros((1, cp), jnp.float32).at[0, :C].set(
        bproj.reshape(C).astype(jnp.float32))
    temp = jnp.ones((1, cp), jnp.float32).at[0, :C].set(
        jnp.repeat(temperature.reshape(num_heads).astype(jnp.float32), d))
    head = jnp.arange(cp, dtype=jnp.int32) // d
    mask = jnp.where(head[:, None] == head[None, :],
                     jnp.float32(0.0), jnp.float32(_NEG_INF))
    return dict(C=C, cp=cp, num_heads=num_heads,
                wq=wq, wk=wk, wv=wv, wproj=wp, bproj=bp, temp=temp, mask=mask)


def _pad_tokens_and_channels(x, n_pad, cp):
    B, N, C = x.shape
    if n_pad == N and cp == C:            # padding is a no-op -> just cast
        return x.astype(jnp.bfloat16)
    xp = jnp.zeros((B, n_pad, cp), jnp.bfloat16)
    return xp.at[:, :N, :C].set(x.astype(jnp.bfloat16))


def _wspec(shape, index_map, buffered):
    """BlockSpec for a constant-index (resident) block."""
    if buffered:
        return pl.BlockSpec(shape, index_map, pipeline_mode=pl.Buffered(1))
    return pl.BlockSpec(shape, index_map)


def _xca_forward_impl(x, params, n_tile, out_dtype, buffered, vmem_limit):
    B, N, C = x.shape
    cp = params["cp"]

    if n_tile is None:
        # ---- Path A: fused whole-N single-pass kernel -----------------------
        n_pad = _round_up(N, _SUBLANE)
        x_p = _pad_tokens_and_channels(x, n_pad, cp)
        out = pl.pallas_call(
            _xca_fused_kernel,
            out_shape=jax.ShapeDtypeStruct((B, n_pad, cp), out_dtype),
            grid=(B,),
            in_specs=[
                pl.BlockSpec((1, n_pad, cp), lambda b: (b, 0, 0)),
                _wspec((cp, cp), lambda b: (0, 0), buffered),   # Wq
                _wspec((cp, cp), lambda b: (0, 0), buffered),   # Wk
                _wspec((cp, cp), lambda b: (0, 0), buffered),   # Wv
                _wspec((cp, cp), lambda b: (0, 0), buffered),   # Wproj
                _wspec((1, cp), lambda b: (0, 0), buffered),    # bias
                _wspec((1, cp), lambda b: (0, 0), buffered),    # temperature
                _wspec((cp, cp), lambda b: (0, 0), buffered),   # block-diag mask
            ],
            out_specs=pl.BlockSpec((1, n_pad, cp), lambda b: (b, 0, 0)),
            compiler_params=pltpu.CompilerParams(
                dimension_semantics=("parallel",),
                vmem_limit_bytes=vmem_limit),
        )(x_p, params["wq"], params["wk"], params["wv"], params["wproj"],
          params["bproj"], params["temp"], params["mask"])
    else:
        # ---- Path B: N-tiled two-pass variant --------------------------------
        tn = n_tile
        n_pad = _round_up(N, tn)
        nt = n_pad // tn
        x_p = _pad_tokens_and_channels(x, n_pad, cp)

        # Pass 1: raw transposed Gram + per-channel sums-of-squares over tiles.
        gram_t, qss, kss = pl.pallas_call(
            _xca_gram_kernel,
            out_shape=(jax.ShapeDtypeStruct((B, cp, cp), jnp.float32),
                       jax.ShapeDtypeStruct((B, 1, cp), jnp.float32),
                       jax.ShapeDtypeStruct((B, 1, cp), jnp.float32)),
            grid=(B, nt),
            in_specs=[
                pl.BlockSpec((1, tn, cp), lambda b, t: (b, t, 0)),
                _wspec((cp, cp), lambda b, t: (0, 0), buffered),
                _wspec((cp, cp), lambda b, t: (0, 0), buffered),
            ],
            out_specs=(pl.BlockSpec((1, cp, cp), lambda b, t: (b, 0, 0)),
                       pl.BlockSpec((1, 1, cp), lambda b, t: (b, 0, 0)),
                       pl.BlockSpec((1, 1, cp), lambda b, t: (b, 0, 0))),
            compiler_params=pltpu.CompilerParams(
                dimension_semantics=("parallel", "arbitrary"),
                vmem_limit_bytes=vmem_limit),
        )(x_p, params["wq"], params["wk"])

        # Finalize normalization + block-diagonal softmax ONCE per batch elem
        # (O(B*Cp^2) elementwise; negligible vs. the O(B*N*Cp^2) matmuls).
        q_inv = lax.rsqrt(jnp.maximum(qss, _EPS2))             # (B, 1, Cp)
        k_inv = lax.rsqrt(jnp.maximum(kss, _EPS2))             # (B, 1, Cp)
        logits = gram_t * jnp.swapaxes(k_inv, -1, -2) * q_inv
        logits = logits * params["temp"][None] + params["mask"]
        attn_t = jax.nn.softmax(logits, axis=1).astype(jnp.bfloat16)

        # Pass 2: stream token tiles; fully parallel grid (both v7x TCs busy).
        out = pl.pallas_call(
            _xca_out_kernel,
            out_shape=jax.ShapeDtypeStruct((B, n_pad, cp), out_dtype),
            grid=(B, nt),
            in_specs=[
                pl.BlockSpec((1, tn, cp), lambda b, t: (b, t, 0)),
                _wspec((cp, cp), lambda b, t: (0, 0), buffered),   # Wv
                pl.BlockSpec((1, cp, cp), lambda b, t: (b, 0, 0)),  # attn_T
                _wspec((cp, cp), lambda b, t: (0, 0), buffered),   # Wproj
                _wspec((1, cp), lambda b, t: (0, 0), buffered),    # bias
            ],
            out_specs=pl.BlockSpec((1, tn, cp), lambda b, t: (b, t, 0)),
            compiler_params=pltpu.CompilerParams(
                dimension_semantics=("parallel", "parallel"),
                vmem_limit_bytes=vmem_limit),
        )(x_p, params["wv"], attn_t, params["wproj"], params["bproj"])

    if out.shape[1] != N or cp != C:
        out = out[:, :N, :C]
    return out


def xca_forward(x, params, *, n_tile=None, out_dtype=jnp.bfloat16):
    """XCA forward. `params` comes from xca_prepare_params.

    If `n_tile` is None the fused whole-N kernel is used when it fits the
    hardware-derived VMEM budget; otherwise an N-tiled two-pass variant is
    selected automatically (or forced by passing `n_tile`).
    """
    B, N, C = x.shape
    assert C == params["C"], (C, params["C"])
    cp = params["cp"]
    budget = _vmem_budget_bytes()

    if n_tile is None and _fused_vmem_bytes(_round_up(N, _SUBLANE), cp) > budget:
        n_tile = _SUBLANE
        for cand in (2048, 1024, 512, 256, 128, 64, 32, 16):
            if cand <= _round_up(N, _SUBLANE) and _tiled_vmem_bytes(cand, cp) <= budget:
                n_tile = cand
                break
    if n_tile is not None:
        n_tile = max(_SUBLANE, _round_up(int(n_tile), _SUBLANE))

    try:
        return _xca_forward_impl(x, params, n_tile, out_dtype, True, budget)
    except Exception:
        # pl.Buffered(1) resident-weight specs unsupported on this jax build ->
        # fall back to default double-buffered weight blocks.
        return _xca_forward_impl(x, params, n_tile, out_dtype, False, budget)


# ---------------------------------------------------------------------------
# Pure-JAX reference (f32 transliteration of the PyTorch forward)
# ---------------------------------------------------------------------------
def xca_reference(x, wqkv_t, wproj_t, bproj, temperature, num_heads):
    B, N, C = x.shape
    d = C // num_heads
    qkv = x @ wqkv_t                                          # (B, N, 3C)
    qkv = qkv.reshape(B, N, 3, num_heads, d).transpose(2, 0, 3, 1, 4)
    q, k, v = qkv[0], qkv[1], qkv[2]                          # (B, H, N, d)
    q = jnp.swapaxes(q, -2, -1)                               # (B, H, d, N)
    k = jnp.swapaxes(k, -2, -1)
    v = jnp.swapaxes(v, -2, -1)
    q = q / jnp.maximum(jnp.linalg.norm(q, axis=-1, keepdims=True), 1e-12)
    k = k / jnp.maximum(jnp.linalg.norm(k, axis=-1, keepdims=True), 1e-12)
    attn = (q @ jnp.swapaxes(k, -2, -1)) * temperature.reshape(1, num_heads, 1, 1)
    attn = jax.nn.softmax(attn, axis=-1)
    y = (attn @ v).transpose(0, 3, 1, 2).reshape(B, N, C)
    return y @ wproj_t + bproj.reshape(1, 1, C)


if __name__ == "__main__":
    B, N, C, H = 2, 32, 32, 8                                  # d_head = 4

    key = jax.random.PRNGKey(0)
    kx, kq, kp, kb, kt = jax.random.split(key, 5)
    x = jax.random.normal(kx, (B, N, C), jnp.float32)

    # Synthetic parameters matching the module __init__ shapes:
    #   qkv: Linear(C, 3C, bias=False) -> pre-transposed (C, 3C)
    #   proj: Linear(C, C)             -> pre-transposed (C, C), bias (C,)
    #   temperature: Parameter(H, 1, 1) -> (H,)  (non-trivial values to
    #   exercise the per-head temperature path).
    wqkv_t = 0.05 * jax.random.normal(kq, (C, 3 * C), jnp.float32)
    wproj_t = 0.05 * jax.random.normal(kp, (C, C), jnp.float32)
    bproj = 0.01 * jax.random.normal(kb, (C,), jnp.float32)
    temperature = 0.5 + jax.random.uniform(kt, (H,), jnp.float32)

    params = xca_prepare_params(wqkv_t, wproj_t, bproj, temperature, H)
    ref = xca_reference(x, wqkv_t, wproj_t, bproj, temperature, H)

    # Path A: fused whole-N single-pass kernel (auto-selected at this size).
    out_fused = jax.block_until_ready(xca_forward(x, params))
    assert out_fused.shape == (B, N, C)
    err_fused = float(jnp.max(jnp.abs(out_fused.astype(jnp.float32) - ref)))
    assert jnp.allclose(out_fused.astype(jnp.float32), ref,
                        atol=2e-2, rtol=2e-2), err_fused

    # Path B: N-tiled two-pass variant (forced small tile -> 2 token tiles, so
    # the cross-tile Gram / sum-of-squares accumulation path is exercised).
    out_tiled = jax.block_until_ready(xca_forward(x, params, n_tile=16))
    assert out_tiled.shape == (B, N, C)
    err_tiled = float(jnp.max(jnp.abs(out_tiled.astype(jnp.float32) - ref)))
    assert jnp.allclose(out_tiled.astype(jnp.float32), ref,
                        atol=2e-2, rtol=2e-2), err_tiled

    print("KERNEL_OK")
</pallas_src>

<mosaic_0001>
module attributes {stable_mosaic.version = 11 : i64} {
  func.func @_xca_fused_kernel(%arg0: i32, %arg1: memref<1x32x128xbf16, #tpu.memory_space<vmem>>, %arg2: memref<128x128xbf16, #tpu.memory_space<vmem>>, %arg3: memref<128x128xbf16, #tpu.memory_space<vmem>>, %arg4: memref<128x128xbf16, #tpu.memory_space<vmem>>, %arg5: memref<128x128xbf16, #tpu.memory_space<vmem>>, %arg6: memref<1x128xf32, #tpu.memory_space<vmem>>, %arg7: memref<1x128xf32, #tpu.memory_space<vmem>>, %arg8: memref<128x128xf32, #tpu.memory_space<vmem>>, %arg9: memref<1x32x128xbf16, #tpu.memory_space<vmem>>) attributes {dimension_semantics = [#tpu.dimension_semantics<parallel>], iteration_bounds = array<i64: 2>, scalar_prefetch = 0 : i64, scratch_operands = 0 : i64, tpu.core_type = #tpu.core_type<tc>, window_params = [{transform_indices = @transform_0, window_bounds = array<i64: 1, 32, 128>}, {pipeline_mode = #tpu.pipeline_mode<synchronous>, transform_indices = @transform_1, window_bounds = array<i64: 128, 128>}, {pipeline_mode = #tpu.pipeline_mode<synchronous>, transform_indices = @transform_2, window_bounds = array<i64: 128, 128>}, {pipeline_mode = #tpu.pipeline_mode<synchronous>, transform_indices = @transform_3, window_bounds = array<i64: 128, 128>}, {pipeline_mode = #tpu.pipeline_mode<synchronous>, transform_indices = @transform_4, window_bounds = array<i64: 128, 128>}, {pipeline_mode = #tpu.pipeline_mode<synchronous>, transform_indices = @transform_5, window_bounds = array<i64: 1, 128>}, {pipeline_mode = #tpu.pipeline_mode<synchronous>, transform_indices = @transform_6, window_bounds = array<i64: 1, 128>}, {pipeline_mode = #tpu.pipeline_mode<synchronous>, transform_indices = @transform_7, window_bounds = array<i64: 128, 128>}, {transform_indices = @transform_8, window_bounds = array<i64: 1, 32, 128>}]} {
    %c0 = arith.constant 0 : index
    %c0_0 = arith.constant 0 : index
    %c0_1 = arith.constant 0 : index
    %0 = vector.load %arg1[%c0, %c0_0, %c0_1] : memref<1x32x128xbf16, #tpu.memory_space<vmem>>, vector<1x32x128xbf16>
    %1 = vector.shape_cast %0 : vector<1x32x128xbf16> to vector<32x128xbf16>
    %c0_2 = arith.constant 0 : index
    %c0_3 = arith.constant 0 : index
    %2 = vector.load %arg2[%c0_2, %c0_3] : memref<128x128xbf16, #tpu.memory_space<vmem>>, vector<128x128xbf16>
    %cst = arith.constant dense<0.000000e+00> : vector<32x128xf32>
    %3 = tpu.matmul %1, %2, %cst {dimension_numbers = #tpu.dot_dimension_numbers<[1], [0], [0], [1], [0, 0, 1, 1], [], []>} : vector<32x128xbf16>, vector<128x128xbf16>, vector<32x128xf32> -> vector<32x128xf32>
    %c0_4 = arith.constant 0 : index
    %c0_5 = arith.constant 0 : index
    %4 = vector.load %arg3[%c0_4, %c0_5] : memref<128x128xbf16, #tpu.memory_space<vmem>>, vector<128x128xbf16>
    %cst_6 = arith.constant dense<0.000000e+00> : vector<32x128xf32>
    %5 = tpu.matmul %1, %4, %cst_6 {dimension_numbers = #tpu.dot_dimension_numbers<[1], [0], [0], [1], [0, 0, 1, 1], [], []>} : vector<32x128xbf16>, vector<128x128xbf16>, vector<32x128xf32> -> vector<32x128xf32>
    %6 = arith.mulf %3, %3 : vector<32x128xf32>
    %cst_7 = arith.constant dense<0.000000e+00> : vector<128xf32>
    %7 = vector.multi_reduction <add>, %6, %cst_7 [0] : vector<32x128xf32> to vector<128xf32>
    %8 = vector.shape_cast %7 : vector<128xf32> to vector<1x128xf32>
    %cst_8 = arith.constant 1.000000e-24 : f32
    %9 = vector.broadcast %cst_8 : f32 to vector<1x128xf32>
    %10 = arith.maximumf %8, %9 : vector<1x128xf32>
    %11 = math.rsqrt %10 : vector<1x128xf32>
    %12 = arith.mulf %5, %5 : vector<32x128xf32>
    %cst_9 = arith.constant dense<0.000000e+00> : vector<128xf32>
    %13 = vector.multi_reduction <add>, %12, %cst_9 [0] : vector<32x128xf32> to vector<128xf32>
    %14 = vector.shape_cast %13 : vector<128xf32> to vector<1x128xf32>
    %cst_10 = arith.constant 1.000000e-24 : f32
    %15 = vector.broadcast %cst_10 : f32 to vector<1x128xf32>
    %16 = arith.maximumf %14, %15 : vector<1x128xf32>
    %17 = math.rsqrt %16 : vector<1x128xf32>
    %18 = vector.broadcast %11 : vector<1x128xf32> to vector<32x128xf32>
    %19 = arith.mulf %3, %18 : vector<32x128xf32>
    %20 = arith.truncf %19 : vector<32x128xf32> to vector<32x128xbf16>
    %21 = vector.broadcast %17 : vector<1x128xf32> to vector<32x128xf32>
    %22 = arith.mulf %5, %21 : vector<32x128xf32>
    %23 = arith.truncf %22 : vector<32x128xf32> to vector<32x128xbf16>
    %cst_11 = arith.constant dense<0.000000e+00> : vector<128x128xf32>
    %24 = tpu.matmul %23, %20, %cst_11 {dimension_numbers = #tpu.dot_dimension_numbers<[0], [0], [1], [1], [0, 1, 1, 1], [], []>} : vector<32x128xbf16>, vector<32x128xbf16>, vector<128x128xf32> -> vector<128x128xf32>
    %c0_12 = arith.constant 0 : index
    %c0_13 = arith.constant 0 : index
    %25 = vector.load %arg7[%c0_12, %c0_13] : memref<1x128xf32, #tpu.memory_space<vmem>>, vector<1x128xf32>
    %26 = vector.broadcast %25 : vector<1x128xf32> to vector<128x128xf32>
    %27 = arith.mulf %24, %26 : vector<128x128xf32>
    %c0_14 = arith.constant 0 : index
    %c0_15 = arith.constant 0 : index
    %28 = vector.load %arg8[%c0_14, %c0_15] : memref<128x128xf32, #tpu.memory_space<vmem>>, vector<128x128xf32>
    %29 = arith.addf %27, %28 : vector<128x128xf32>
    %cst_16 = arith.constant dense<0xFF800000> : vector<128xf32>
    %30 = vector.multi_reduction <maximumf>, %29, %cst_16 [0] : vector<128x128xf32> to vector<128xf32>
    %31 = vector.shape_cast %30 : vector<128xf32> to vector<1x128xf32>
    %32 = vector.broadcast %31 : vector<1x128xf32> to vector<128x128xf32>
    %33 = arith.subf %29, %32 : vector<128x128xf32>
    %34 = math.exp %33 : vector<128x128xf32>
    %cst_17 = arith.constant dense<0.000000e+00> : vector<128xf32>
    %35 = vector.multi_reduction <add>, %34, %cst_17 [0] : vector<128x128xf32> to vector<128xf32>
    %36 = vector.shape_cast %35 : vector<128xf32> to vector<1x128xf32>
    %37 = tpu.reciprocal %36 {approx = true} : vector<1x128xf32> -> vector<1x128xf32>
    %38 = vector.broadcast %37 : vector<1x128xf32> to vector<128x128xf32>
    %39 = arith.mulf %34, %38 : vector<128x128xf32>
    %40 = arith.truncf %39 : vector<128x128xf32> to vector<128x128xbf16>
    %c0_18 = arith.constant 0 : index
    %c0_19 = arith.constant 0 : index
    %41 = vector.load %arg4[%c0_18, %c0_19] : memref<128x128xbf16, #tpu.memory_space<vmem>>, vector<128x128xbf16>
    %cst_20 = arith.constant dense<0.000000e+00> : vector<32x128xf32>
    %42 = tpu.matmul %1, %41, %cst_20 {dimension_numbers = #tpu.dot_dimension_numbers<[1], [0], [0], [1], [0, 0, 1, 1], [], []>} : vector<32x128xbf16>, vector<128x128xbf16>, vector<32x128xf32> -> vector<32x128xf32>
    %43 = arith.truncf %42 : vector<32x128xf32> to vector<32x128xbf16>
    %cst_21 = arith.constant dense<0.000000e+00> : vector<32x128xf32>
    %44 = tpu.matmul %43, %40, %cst_21 {dimension_numbers = #tpu.dot_dimension_numbers<[1], [0], [0], [1], [0, 0, 1, 1], [], []>} : vector<32x128xbf16>, vector<128x128xbf16>, vector<32x128xf32> -> vector<32x128xf32>
    %45 = arith.truncf %44 : vector<32x128xf32> to vector<32x128xbf16>
    %c0_22 = arith.constant 0 : index
    %c0_23 = arith.constant 0 : index
    %46 = vector.load %arg5[%c0_22, %c0_23] : memref<128x128xbf16, #tpu.memory_space<vmem>>, vector<128x128xbf16>
    %cst_24 = arith.constant dense<0.000000e+00> : vector<32x128xf32>
    %47 = tpu.matmul %45, %46, %cst_24 {dimension_numbers = #tpu.dot_dimension_numbers<[1], [0], [0], [1], [0, 0, 1, 1], [], []>} : vector<32x128xbf16>, vector<128x128xbf16>, vector<32x128xf32> -> vector<32x128xf32>
    %c0_25 = arith.constant 0 : index
    %c0_26 = arith.constant 0 : index
    %48 = vector.load %arg6[%c0_25, %c0_26] : memref<1x128xf32, #tpu.memory_space<vmem>>, vector<1x128xf32>
    %49 = vector.broadcast %48 : vector<1x128xf32> to vector<32x128xf32>
    %50 = arith.addf %47, %49 : vector<32x128xf32>
    %51 = arith.truncf %50 : vector<32x128xf32> to vector<32x128xbf16>
    %c0_27 = arith.constant 0 : index
    %c0_28 = arith.constant 0 : index
    %c0_29 = arith.constant 0 : index
    %52 = vector.load %arg9[%c0_27, %c0_28, %c0_29] : memref<1x32x128xbf16, #tpu.memory_space<vmem>>, vector<1x32x128xbf16>
    %53 = vector.shape_cast %52 : vector<1x32x128xbf16> to vector<32x128xbf16>
    %54 = vector.shape_cast %51 : vector<32x128xbf16> to vector<1x32x128xbf16>
    tpu.vector_store %arg9[%c0_27, %c0_28, %c0_29], %54 {strides = array<i32>} : memref<1x32x128xbf16, #tpu.memory_space<vmem>>, vector<1x32x128xbf16>,
    return
  }
  func.func @transform_0(%arg0: i32) -> (i32, i32, i32) {
    %c0_i32 = arith.constant 0 : i32
    %c0_i32_0 = arith.constant 0 : i32
    %c0_i32_1 = arith.constant 0 : i32
    return %arg0, %c0_i32, %c0_i32_0 : i32, i32, i32
  }
  func.func @transform_1(%arg0: i32) -> (i32, i32) {
    %c0_i32 = arith.constant 0 : i32
    %c0_i32_0 = arith.constant 0 : i32
    %c0_i32_1 = arith.constant 0 : i32
    return %c0_i32, %c0_i32_0 : i32, i32
  }
  func.func @transform_2(%arg0: i32) -> (i32, i32) {
    %c0_i32 = arith.constant 0 : i32
    %c0_i32_0 = arith.constant 0 : i32
    %c0_i32_1 = arith.constant 0 : i32
    return %c0_i32, %c0_i32_0 : i32, i32
  }
  func.func @transform_3(%arg0: i32) -> (i32, i32) {
    %c0_i32 = arith.constant 0 : i32
    %c0_i32_0 = arith.constant 0 : i32
    %c0_i32_1 = arith.constant 0 : i32
    return %c0_i32, %c0_i32_0 : i32, i32
  }
  func.func @transform_4(%arg0: i32) -> (i32, i32) {
    %c0_i32 = arith.constant 0 : i32
    %c0_i32_0 = arith.constant 0 : i32
    %c0_i32_1 = arith.constant 0 : i32
    return %c0_i32, %c0_i32_0 : i32, i32
  }
  func.func @transform_5(%arg0: i32) -> (i32, i32) {
    %c0_i32 = arith.constant 0 : i32
    %c0_i32_0 = arith.constant 0 : i32
    %c0_i32_1 = arith.constant 0 : i32
    return %c0_i32, %c0_i32_0 : i32, i32
  }
  func.func @transform_6(%arg0: i32) -> (i32, i32) {
    %c0_i32 = arith.constant 0 : i32
    %c0_i32_0 = arith.constant 0 : i32
    %c0_i32_1 = arith.constant 0 : i32
    return %c0_i32, %c0_i32_0 : i32, i32
  }
  func.func @transform_7(%arg0: i32) -> (i32, i32) {
    %c0_i32 = arith.constant 0 : i32
    %c0_i32_0 = arith.constant 0 : i32
    %c0_i32_1 = arith.constant 0 : i32
    return %c0_i32, %c0_i32_0 : i32, i32
  }
  func.func @transform_8(%arg0: i32) -> (i32, i32, i32) {
    %c0_i32 = arith.constant 0 : i32
    %c0_i32_0 = arith.constant 0 : i32
    %c0_i32_1 = arith.constant 0 : i32
    return %arg0, %c0_i32, %c0_i32_0 : i32, i32, i32
  }
}

module attributes {stable_mosaic.version = 11 : i64} {
  func.func @_xca_fused_kernel(%arg0: i32, %arg1: memref<1x32x128xbf16, #tpu.memory_space<vmem>>, %arg2: memref<128x128xbf16, #tpu.memory_space<vmem>>, %arg3: memref<128x128xbf16, #tpu.memory_space<vmem>>, %arg4: memref<128x128xbf16, #tpu.memory_space<vmem>>, %arg5: memref<128x128xbf16, #tpu.memory_space<vmem>>, %arg6: memref<1x128xf32, #tpu.memory_space<vmem>>, %arg7: memref<1x128xf32, #tpu.memory_space<vmem>>, %arg8: memref<128x128xf32, #tpu.memory_space<vmem>>, %arg9: memref<1x32x128xbf16, #tpu.memory_space<vmem>>) attributes {dimension_semantics = [#tpu.dimension_semantics<parallel>], iteration_bounds = array<i64: 2>, scalar_prefetch = 0 : i64, scratch_operands = 0 : i64, tpu.core_type = #tpu.core_type<tc>, window_params = [{transform_indices = @transform_0, window_bounds = array<i64: 1, 32, 128>}, {pipeline_mode = #tpu.pipeline_mode<synchronous>, transform_indices = @transform_1, window_bounds = array<i64: 128, 128>}, {pipeline_mode = #tpu.pipeline_mode<synchronous>, transform_indices = @transform_2, window_bounds = array<i64: 128, 128>}, {pipeline_mode = #tpu.pipeline_mode<synchronous>, transform_indices = @transform_3, window_bounds = array<i64: 128, 128>}, {pipeline_mode = #tpu.pipeline_mode<synchronous>, transform_indices = @transform_4, window_bounds = array<i64: 128, 128>}, {pipeline_mode = #tpu.pipeline_mode<synchronous>, transform_indices = @transform_5, window_bounds = array<i64: 1, 128>}, {pipeline_mode = #tpu.pipeline_mode<synchronous>, transform_indices = @transform_6, window_bounds = array<i64: 1, 128>}, {pipeline_mode = #tpu.pipeline_mode<synchronous>, transform_indices = @transform_7, window_bounds = array<i64: 128, 128>}, {transform_indices = @transform_8, window_bounds = array<i64: 1, 32, 128>}]} {
    %c0 = arith.constant 0 : index
    %c0_0 = arith.constant 0 : index
    %c0_1 = arith.constant 0 : index
    %0 = vector.load %arg1[%c0, %c0_0, %c0_1] : memref<1x32x128xbf16, #tpu.memory_space<vmem>>, vector<1x32x128xbf16>
    %1 = vector.shape_cast %0 : vector<1x32x128xbf16> to vector<32x128xbf16>
    %c0_2 = arith.constant 0 : index
    %c0_3 = arith.constant 0 : index
    %2 = vector.load %arg2[%c0_2, %c0_3] : memref<128x128xbf16, #tpu.memory_space<vmem>>, vector<128x128xbf16>
    %cst = arith.constant dense<0.000000e+00> : vector<32x128xf32>
    %3 = tpu.matmul %1, %2, %cst {dimension_numbers = #tpu.dot_dimension_numbers<[1], [0], [0], [1], [0, 0, 1, 1], [], []>} : vector<32x128xbf16>, vector<128x128xbf16>, vector<32x128xf32> -> vector<32x128xf32>
    %c0_4 = arith.constant 0 : index
    %c0_5 = arith.constant 0 : index
    %4 = vector.load %arg3[%c0_4, %c0_5] : memref<128x128xbf16, #tpu.memory_space<vmem>>, vector<128x128xbf16>
    %cst_6 = arith.constant dense<0.000000e+00> : vector<32x128xf32>
    %5 = tpu.matmul %1, %4, %cst_6 {dimension_numbers = #tpu.dot_dimension_numbers<[1], [0], [0], [1], [0, 0, 1, 1], [], []>} : vector<32x128xbf16>, vector<128x128xbf16>, vector<32x128xf32> -> vector<32x128xf32>
    %6 = arith.mulf %3, %3 : vector<32x128xf32>
    %cst_7 = arith.constant dense<0.000000e+00> : vector<128xf32>
    %7 = vector.multi_reduction <add>, %6, %cst_7 [0] : vector<32x128xf32> to vector<128xf32>
    %8 = vector.shape_cast %7 : vector<128xf32> to vector<1x128xf32>
    %cst_8 = arith.constant 1.000000e-24 : f32
    %9 = vector.broadcast %cst_8 : f32 to vector<1x128xf32>
    %10 = arith.maximumf %8, %9 : vector<1x128xf32>
    %11 = math.rsqrt %10 : vector<1x128xf32>
    %12 = arith.mulf %5, %5 : vector<32x128xf32>
    %cst_9 = arith.constant dense<0.000000e+00> : vector<128xf32>
    %13 = vector.multi_reduction <add>, %12, %cst_9 [0] : vector<32x128xf32> to vector<128xf32>
    %14 = vector.shape_cast %13 : vector<128xf32> to vector<1x128xf32>
    %cst_10 = arith.constant 1.000000e-24 : f32
    %15 = vector.broadcast %cst_10 : f32 to vector<1x128xf32>
    %16 = arith.maximumf %14, %15 : vector<1x128xf32>
    %17 = math.rsqrt %16 : vector<1x128xf32>
    %18 = vector.broadcast %11 : vector<1x128xf32> to vector<32x128xf32>
    %19 = arith.mulf %3, %18 : vector<32x128xf32>
    %20 = arith.truncf %19 : vector<32x128xf32> to vector<32x128xbf16>
    %21 = vector.broadcast %17 : vector<1x128xf32> to vector<32x128xf32>
    %22 = arith.mulf %5, %21 : vector<32x128xf32>
    %23 = arith.truncf %22 : vector<32x128xf32> to vector<32x128xbf16>
    %cst_11 = arith.constant dense<0.000000e+00> : vector<128x128xf32>
    %24 = tpu.matmul %23, %20, %cst_11 {dimension_numbers = #tpu.dot_dimension_numbers<[0], [0], [1], [1], [0, 1, 1, 1], [], []>} : vector<32x128xbf16>, vector<32x128xbf16>, vector<128x128xf32> -> vector<128x128xf32>
    %c0_12 = arith.constant 0 : index
    %c0_13 = arith.constant 0 : index
    %25 = vector.load %arg7[%c0_12, %c0_13] : memref<1x128xf32, #tpu.memory_space<vmem>>, vector<1x128xf32>
    %26 = vector.broadcast %25 : vector<1x128xf32> to vector<128x128xf32>
    %27 = arith.mulf %24, %26 : vector<128x128xf32>
    %c0_14 = arith.constant 0 : index
    %c0_15 = arith.constant 0 : index
    %28 = vector.load %arg8[%c0_14, %c0_15] : memref<128x128xf32, #tpu.memory_space<vmem>>, vector<128x128xf32>
    %29 = arith.addf %27, %28 : vector<128x128xf32>
    %cst_16 = arith.constant dense<0xFF800000> : vector<128xf32>
    %30 = vector.multi_reduction <maximumf>, %29, %cst_16 [0] : vector<128x128xf32> to vector<128xf32>
    %31 = vector.shape_cast %30 : vector<128xf32> to vector<1x128xf32>
    %32 = vector.broadcast %31 : vector<1x128xf32> to vector<128x128xf32>
    %33 = arith.subf %29, %32 : vector<128x128xf32>
    %34 = math.exp %33 : vector<128x128xf32>
    %cst_17 = arith.constant dense<0.000000e+00> : vector<128xf32>
    %35 = vector.multi_reduction <add>, %34, %cst_17 [0] : vector<128x128xf32> to vector<128xf32>
    %36 = vector.shape_cast %35 : vector<128xf32> to vector<1x128xf32>
    %37 = tpu.reciprocal %36 {approx = true} : vector<1x128xf32> -> vector<1x128xf32>
    %38 = vector.broadcast %37 : vector<1x128xf32> to vector<128x128xf32>
    %39 = arith.mulf %34, %38 : vector<128x128xf32>
    %40 = arith.truncf %39 : vector<128x128xf32> to vector<128x128xbf16>
    %c0_18 = arith.constant 0 : index
    %c0_19 = arith.constant 0 : index
    %41 = vector.load %arg4[%c0_18, %c0_19] : memref<128x128xbf16, #tpu.memory_space<vmem>>, vector<128x128xbf16>
    %cst_20 = arith.constant dense<0.000000e+00> : vector<32x128xf32>
    %42 = tpu.matmul %1, %41, %cst_20 {dimension_numbers = #tpu.dot_dimension_numbers<[1], [0], [0], [1], [0, 0, 1, 1], [], []>} : vector<32x128xbf16>, vector<128x128xbf16>, vector<32x128xf32> -> vector<32x128xf32>
    %43 = arith.truncf %42 : vector<32x128xf32> to vector<32x128xbf16>
    %cst_21 = arith.constant dense<0.000000e+00> : vector<32x128xf32>
    %44 = tpu.matmul %43, %40, %cst_21 {dimension_numbers = #tpu.dot_dimension_numbers<[1], [0], [0], [1], [0, 0, 1, 1], [], []>} : vector<32x128xbf16>, vector<128x128xbf16>, vector<32x128xf32> -> vector<32x128xf32>
    %45 = arith.truncf %44 : vector<32x128xf32> to vector<32x128xbf16>
    %c0_22 = arith.constant 0 : index
    %c0_23 = arith.constant 0 : index
    %46 = vector.load %arg5[%c0_22, %c0_23] : memref<128x128xbf16, #tpu.memory_space<vmem>>, vector<128x128xbf16>
    %cst_24 = arith.constant dense<0.000000e+00> : vector<32x128xf32>
    %47 = tpu.matmul %45, %46, %cst_24 {dimension_numbers = #tpu.dot_dimension_numbers<[1], [0], [0], [1], [0, 0, 1, 1], [], []>} : vector<32x128xbf16>, vector<128x128xbf16>, vector<32x128xf32> -> vector<32x128xf32>
    %c0_25 = arith.constant 0 : index
    %c0_26 = arith.constant 0 : index
    %48 = vector.load %arg6[%c0_25, %c0_26] : memref<1x128xf32, #tpu.memory_space<vmem>>, vector<1x128xf32>
    %49 = vector.broadcast %48 : vector<1x128xf32> to vector<32x128xf32>
    %50 = arith.addf %47, %49 : vector<32x128xf32>
    %51 = arith.truncf %50 : vector<32x128xf32> to vector<32x128xbf16>
    %c0_27 = arith.constant 0 : index
    %c0_28 = arith.constant 0 : index
    %c0_29 = arith.constant 0 : index
    %52 = vector.load %arg9[%c0_27, %c0_28, %c0_29] : memref<1x32x128xbf16, #tpu.memory_space<vmem>>, vector<1x32x128xbf16>
    %53 = vector.shape_cast %52 : vector<1x32x128xbf16> to vector<32x128xbf16>
    %54 = vector.shape_cast %51 : vector<32x128xbf16> to vector<1x32x128xbf16>
    tpu.vector_store %arg9[%c0_27, %c0_28, %c0_29], %54 {strides = array<i32>} : memref<1x32x128xbf16, #tpu.memory_space<vmem>>, vector<1x32x128xbf16>,
    return
  }
  func.func @transform_0(%arg0: i32) -> (i32, i32, i32) {
    %c0_i32 = arith.constant 0 : i32
    %c0_i32_0 = arith.constant 0 : i32
    %c0_i32_1 = arith.constant 0 : i32
    return %arg0, %c0_i32, %c0_i32_0 : i32, i32, i32
  }
  func.func @transform_1(%arg0: i32) -> (i32, i32) {
    %c0_i32 = arith.constant 0 : i32
    %c0_i32_0 = arith.constant 0 : i32
    %c0_i32_1 = arith.constant 0 : i32
    return %c0_i32, %c0_i32_0 : i32, i32
  }
  func.func @transform_2(%arg0: i32) -> (i32, i32) {
    %c0_i32 = arith.constant 0 : i32
    %c0_i32_0 = arith.constant 0 : i32
    %c0_i32_1 = arith.constant 0 : i32
    return %c0_i32, %c0_i32_0 : i32, i32
  }
  func.func @transform_3(%arg0: i32) -> (i32, i32) {
    %c0_i32 = arith.constant 0 : i32
    %c0_i32_0 = arith.constant 0 : i32
    %c0_i32_1 = arith.constant 0 : i32
    return %c0_i32, %c0_i32_0 : i32, i32
  }
  func.func @transform_4(%arg0: i32) -> (i32, i32) {
    %c0_i32 = arith.constant 0 : i32
    %c0_i32_0 = arith.constant 0 : i32
    %c0_i32_1 = arith.constant 0 : i32
    return %c0_i32, %c0_i32_0 : i32, i32
  }
  func.func @transform_5(%arg0: i32) -> (i32, i32) {
    %c0_i32 = arith.constant 0 : i32
    %c0_i32_0 = arith.constant 0 : i32
    %c0_i32_1 = arith.constant 0 : i32
    return %c0_i32, %c0_i32_0 : i32, i32
  }
  func.func @transform_6(%arg0: i32) -> (i32, i32) {
    %c0_i32 = arith.constant 0 : i32
    %c0_i32_0 = arith.constant 0 : i32
    %c0_i32_1 = arith.constant 0 : i32
    return %c0_i32, %c0_i32_0 : i32, i32
  }
  func.func @transform_7(%arg0: i32) -> (i32, i32) {
    %c0_i32 = arith.constant 0 : i32
    %c0_i32_0 = arith.constant 0 : i32
    %c0_i32_1 = arith.constant 0 : i32
    return %c0_i32, %c0_i32_0 : i32, i32
  }
  func.func @transform_8(%arg0: i32) -> (i32, i32, i32) {
    %c0_i32 = arith.constant 0 : i32
    %c0_i32_0 = arith.constant 0 : i32
    %c0_i32_1 = arith.constant 0 : i32
    return %arg0, %c0_i32, %c0_i32_0 : i32, i32, i32
  }
}

</mosaic_0001>

<bundles_post_ra>
// kernel: tpu_custom_call.1
= control target key start
LH: loop header
LB: loop body
LE: loop exit
PB: predicated region body
PF: predicated region fallthrough
CT: control target
= control target key end

     0   :  { %s2636_s0 = inlined_call_operand.hbm [shape: bf16[2,32,128], index: 0, kind: input, shape index: {}]   ;;  %s2637_s1 = inlined_call_operand.hbm [shape: bf16[128,128], index: 1, kind: input, shape index: {}]   ;;  %s2638_s2 = inlined_call_operand.hbm [shape: bf16[128,128], index: 2, kind: input, shape index: {}]   ;;  %s2639_s3 = inlined_call_operand.hbm [shape: bf16[128,128], index: 3, kind: input, shape index: {}]   ;;  %s2640_s4 = inlined_call_operand.hbm [shape: bf16[128,128], index: 4, kind: input, shape index: {}]   ;;  %s2641_s5 = inlined_call_operand.vmem [shape: f32[1,128], index: 5, kind: input, shape index: {}]   ;;  %s2642_s6 = inlined_call_operand.vmem [shape: f32[1,128], index: 6, kind: input, shape index: {}]   ;;  %s2643_s7 = inlined_call_operand.hbm [shape: f32[128,128], index: 7, kind: input, shape index: {}]   ;;  %s2644_s8 = inlined_call_operand.hbm [shape: bf16[2,32,128], index: 8, kind: output, shape index: {}]  }
   0x1   :  { %2649 = sst [smem:[#allocation19_spill]] %s2637_s1 }
   0x2   :  { %13 = vsyncpa [#allocation3], 0 }
   0x3   :  { %15 = vsyncpa [#allocation3 + $0x1], 0 }
   0x4   :  { %16 = vsyncpa [#allocation6], 0 }
   0x5   :  { %17 = vsyncpa [#allocation9], 0 }
   0x6   :  { %18 = vsyncpa [#allocation12], 0 }
   0x7   :  { %19 = vsyncpa [#allocation4], 0 }
   0x8   :  { %21 = vsyncpa [#allocation4 + $0x1], 0  ;;  %s2184_s27 = smov 0   ;;  %s2186_s28 = smov 0  }
   0x9   :  { %s2188_s29 = smov 0   ;;  %s2190_s30 = smov 0  }
   0xa LB: > { %s2126_s9 = smov [#allocation5]   ;;  %s2205_s11 = sadd.s32 4294967295, %s2124_s30   ;;  %s2124_s30 = sphi %s2190_s30, %s2673_s30   ;;  %s2120_s29 = sphi %s2188_s29, %s2672_s29   ;;  %s2116_s28 = sphi %s2186_s28, %s2671_s28   ;;  %s2112_s27 = sphi %s2184_s27, %s2670_s27  }
   0xb   : > { %s243_s10 = sshll.u32 %s2126_s9, 4  ;;  %p1432_p0 = scmp.ge.s32.totalorder %s2124_s30, 1  ;;  %s2210_s10 = int_to_ptr.vmem [resolvable:$true] %s243_s10 }
   0xc   : > { %p2645_p1 = scmp.eq.s32.totalorder %s2205_s11, 0  ;;  %p231_p2 = scmp.lt.s32.totalorder %s2124_s30, 3 }
   0xd   : > { %s2127_s13 = smov [#allocation8]   ;;  %s2128_s16 = smov [#allocation7]  }
   0xe   : > { %p2212_p3 = pnand %p1432_p0, %p231_p2  ;;  %s269_s14 = sshll.u32 %s2127_s13, 4  ;;  %s2225_s14 = int_to_ptr.vmem [resolvable:$true] %s269_s14 }
   0xf   : > { %s256_s17 = sshll.u32 %s2128_s16, 4  ;;  %s2652_s1 = sld [smem:[#allocation19_spill]]  ;;  %s2227_s17 = int_to_ptr.vmem [resolvable:$true] %s256_s17 }
  0x10   : > { %s2650_s12 = scalar_select %p2212_p3, 1, 0 }
  0x11   : > { %p1724_p5 = pneg %p2212_p3 }
  0x13   : > { %p2221_p6 = pnand %p1724_p5, %p2645_p1 }
  0x15   : > { %s1876_s20 = scalar_lea.hbm %s2652_s1, 1024  ;;  %p2237_p8 = pneg %p2221_p6 }
  0x16   : > { %p1877_p7 = scmp.ne.s32.totalorder %s2652_s1, %s1876_s20  ;;  %p1883_p11 = scmp.lt.u32.totalorder %s1876_s20, %s2652_s1 }
  0x18   : > { %p1879_p9 = pnand %p2237_p8, %p1877_p7 }
  0x1a   : > { %p1880_p10 = pneg %p1879_p9 }
  0x1c   : > { %p1885_p12 = pnand %p1883_p11, %p1880_p10 }
  0x1e   : > { %1888 = shalt.err (!%p1885_p12)
}
  0x1f   : > { %s1889_s26 = scalar_lea.vmem %s2210_s10, 1024  ;;  %p1897_p5 = scmp.lt.s32.totalorder %s2210_s10, %s2210_s10 }
  0x20   : > { %p1890_p13 = scmp.ne.s32.totalorder %s2210_s10, %s1889_s26  ;;  %p1898_p4 = scmp.lt.s32.totalorder %s1889_s26, %s1889_s26 }
  0x22   : > { %p1892_p0 = pnand %p1890_p13, %p2237_p8  ;;  %p1899_p7 = por %p1898_p4, %p1897_p5 }
  0x24   : > { %p1893_p2 = pneg %p1892_p0 }
  0x26   : > { %p1900_p9 = pnand %p1899_p7, %p1893_p2 }
  0x28   : > { %1903 = shalt.err (!%p1900_p9)
}
  0x29   : > { %s2647_s9 = smov 64   ;;  %s2130_s13 = smov 4  }
  0x2a   : > { %1727 = dma.hbm_to_vmem [thread:$0]  (!%p2221_p6), %s2652_s1, 1024, %s2210_s10, [#allocation6], %s2647_s9, %s2647_s9, %s2130_s13  }
  0x2b   : > { %s1904_s21 = scalar_lea.hbm %s2639_s3, 1024 }
  0x2c   : > { %p1905_p4 = scmp.ne.s32.totalorder %s2639_s3, %s1904_s21  ;;  %p1911_p12 = scmp.lt.u32.totalorder %s1904_s21, %s2639_s3 }
  0x2e   : > { %p1907_p10 = pnand %p1905_p4, %p2237_p8 }
  0x30   : > { %p1908_p11 = pneg %p1907_p10 }
  0x32   : > { %p1913_p13 = pnand %p1911_p12, %p1908_p11 }
  0x34   : > { %1916 = shalt.err (!%p1913_p13)
}
  0x35   : > { %s1917_s10 = scalar_lea.vmem %s2225_s14, 1024  ;;  %p1925_p7 = scmp.lt.s32.totalorder %s2225_s14, %s2225_s14 }
  0x36   : > { %p1918_p0 = scmp.ne.s32.totalorder %s2225_s14, %s1917_s10  ;;  %p1926_p9 = scmp.lt.s32.totalorder %s1917_s10, %s1917_s10 }
  0x38   : > { %p1920_p2 = pnand %p1918_p0, %p2237_p8  ;;  %p1927_p4 = por %p1926_p9, %p1925_p7 }
  0x3a   : > { %p1921_p5 = pneg %p1920_p2 }
  0x3c   : > { %p1928_p10 = pnand %p1927_p4, %p1921_p5 }
  0x3e   : > { %1931 = shalt.err (!%p1928_p10)
}
  0x3f   : > { %1733 = dma.hbm_to_vmem [thread:$0]  (!%p2221_p6), %s2639_s3, 1024, %s2225_s14, [#allocation9], %s2647_s9, %s2647_s9, %s2130_s13  }
  0x40   : > { %s1932_s21 = scalar_lea.hbm %s2638_s2, 1024 }
  0x41   : > { %p1933_p11 = scmp.ne.s32.totalorder %s2638_s2, %s1932_s21  ;;  %p1939_p0 = scmp.lt.u32.totalorder %s1932_s21, %s2638_s2 }
  0x43   : > { %p1935_p12 = pnand %p1933_p11, %p2237_p8 }
  0x45   : > { %p1936_p13 = pneg %p1935_p12 }
  0x47   : > { %p1941_p2 = pnand %p1939_p0, %p1936_p13 }
  0x49   : > { %1944 = shalt.err (!%p1941_p2)
}
  0x4a   : > { %s1945_s14 = scalar_lea.vmem %s2227_s17, 1024  ;;  %p1953_p4 = scmp.lt.s32.totalorder %s2227_s17, %s2227_s17 }
  0x4b   : > { %p1946_p5 = scmp.ne.s32.totalorder %s2227_s17, %s1945_s14  ;;  %p1954_p10 = scmp.lt.s32.totalorder %s1945_s14, %s1945_s14 }
  0x4d   : > { %p1948_p7 = pnand %p1946_p5, %p2237_p8  ;;  %p1955_p11 = por %p1954_p10, %p1953_p4 }
  0x4f   : > { %p1949_p9 = pneg %p1948_p7 }
  0x51   : > { %p1956_p12 = pnand %p1955_p11, %p1949_p9 }
  0x53   : > { %1959 = shalt.err (!%p1956_p12)
}
  0x54   : > { %1730 = dma.hbm_to_vmem [thread:$0]  (!%p2221_p6), %s2638_s2, 1024, %s2227_s17, [#allocation6], %s2647_s9, %s2647_s9, %s2130_s13  }
  0x55   : > { %s2131_s18 = smov [#allocation10]   ;;  %s2132_s20 = smov [#allocation11]  }
  0x56   : > { %s282_s19 = sshll.u32 %s2131_s18, 4  ;;  %s301_s21 = sshll.u32 %s2132_s20, 4  ;;  %s283_s19 = int_to_ptr.vmem [resolvable:$true] %s282_s19  ;;  %s302_s21 = int_to_ptr.vmem [resolvable:$true] %s301_s21 }
  0x57   : > { %s1960_s25 = scalar_lea.hbm %s2640_s4, 1024 }
  0x58   : > { %p1961_p13 = scmp.ne.s32.totalorder %s2640_s4, %s1960_s25  ;;  %p1967_p5 = scmp.lt.u32.totalorder %s1960_s25, %s2640_s4 }
  0x5a   : > { %p1963_p0 = pnand %p1961_p13, %p2237_p8 }
  0x5c   : > { %p1964_p2 = pneg %p1963_p0 }
  0x5e   : > { %p1969_p7 = pnand %p1967_p5, %p1964_p2 }
  0x60   : > { %1972 = shalt.err (!%p1969_p7)
}
  0x61   : > { %s1973_s17 = scalar_lea.vmem %s283_s19, 1024  ;;  %p1981_p11 = scmp.lt.s32.totalorder %s283_s19, %s283_s19 }
  0x62   : > { %p1974_p9 = scmp.ne.s32.totalorder %s283_s19, %s1973_s17  ;;  %p1982_p12 = scmp.lt.s32.totalorder %s1973_s17, %s1973_s17 }
  0x64   : > { %p1976_p4 = pnand %p1974_p9, %p2237_p8  ;;  %p1983_p1 = por %p1982_p12, %p1981_p11 }
  0x66   : > { %p1977_p10 = pneg %p1976_p4 }
  0x68   : > { %p1984_p3 = pnand %p1983_p1, %p1977_p10 }
  0x6a   : > { %1987 = shalt.err (!%p1984_p3)
}
  0x6b   : > { %1736 = dma.hbm_to_vmem [thread:$0]  (!%p2221_p6), %s2640_s4, 1024, %s283_s19, [#allocation9], %s2647_s9, %s2647_s9, %s2130_s13  }
  0x6c   : > { %s1988_s22 = scalar_lea.hbm %s2643_s7, 2048 }
  0x6d   : > { %p1989_p1 = scmp.ne.s32.totalorder %s2643_s7, %s1988_s22  ;;  %p1995_p0 = scmp.lt.u32.totalorder %s1988_s22, %s2643_s7 }
  0x6f   : > { %p1991_p3 = pnand %p1989_p1, %p2237_p8 }
  0x71   : > { %p1992_p13 = pneg %p1991_p3 }
  0x73   : > { %p1997_p2 = pnand %p1995_p0, %p1992_p13 }
  0x75   : > { %2000 = shalt.err (!%p1997_p2)
}
  0x76   : > { %s2001_s10 = scalar_lea.vmem %s302_s21, 2048  ;;  %p2009_p4 = scmp.lt.s32.totalorder %s302_s21, %s302_s21 }
  0x77   : > { %p2002_p5 = scmp.ne.s32.totalorder %s302_s21, %s2001_s10  ;;  %p2010_p10 = scmp.lt.s32.totalorder %s2001_s10, %s2001_s10 }
  0x79   : > { %p2004_p7 = pnand %p2002_p5, %p2237_p8  ;;  %p2011_p11 = por %p2010_p10, %p2009_p4 }
  0x7b   : > { %p2005_p9 = pneg %p2004_p7 }
  0x7d   : > { %p2012_p12 = pnand %p2011_p11, %p2005_p9 }
  0x7f   : > { %2015 = shalt.err (!%p2012_p12)
}
  0x80   : > { %s2133_s19 = smov 128   ;;  %s2134_s23 = smov 8  }
  0x81   : > { %1739 = dma.hbm_to_vmem [thread:$0]  (!%p2221_p6), %s2643_s7, 2048, %s302_s21, [#allocation12], %s2133_s19, %s2133_s19, %s2134_s23  }
  0x82   : > { %s1431_s16 = sadd.s32 4294967294, %s2124_s30   ;;  %s2354_s18 = sadd.s32 1, %s2124_s30  }
  0x83   : > { %s34_s20 = sadd.s32 1, %s2120_s29  ;;  %s31_s22 = ssub.s32 %s2124_s30, %s2354_s18 }
  0x84   : > { %p41_p8 = scmp.ne.s32.totalorder %s2120_s29, %s2116_s28  ;;  %p32_p1 = scmp.eq.s32.totalorder %s31_s22, 0 }
  0x85   : > { %p42_p3 = scmp.eq.s32.totalorder %s2124_s30, 0  ;;  %p47_p13 = scmp.ne.s32.totalorder %s2116_s28, %s2112_s27 }
  0x86   : > { %p218_p0 = scmp.eq.s32.totalorder %s2205_s11, 1  ;;  %p2654_p5 = scmp.eq.s32.totalorder %s2205_s11, 0 }
  0x87   : > { %s2366_s24 = scalar_select %p32_p1, %s2120_s29, %s34_s20  }
  0x88   : > { %p43_p2 = por %p42_p3, %p41_p8  ;;  %p2370_p7 = por %p2654_p5, %p47_p13 }
  0x89   : > { %p2374_p6 = por %p218_p0, %p41_p8  ;;  %p224_p9 = scmp.eq.s32.totalorder %s1431_s16, 1 }
  0x8a   : > { %p1753_p4 = scmp.lt.s32.totalorder %s2124_s30, 2  ;;  %s315_s25 = sand.u32 1, %s2120_s29  }
  0x8b   : > { %s2656_s21 = scalar_select %p2374_p6, 1, 0 }
  0x8c   : > { %p2380_p10 = por %p224_p9, %p47_p13  ;;  %s1439_s14 = sshll.u32 %s315_s25, 4 }
  0x8d   : > { %s1503_s10 = sshll.u32 %s2124_s30, 8  ;;  %s319_s1 = scalar_lea.vmem [#allocation2], %s1439_s14 }
  0x8e   : > { %s2657_s26 = scalar_select %p2380_p10, 1, 0 }
  0x8f   : > { %s2388_s17 = scalar_lea.hbm %s2636_s0, %s1503_s10  ;;  %s326_s20 = sshll.u32 %s319_s1, 4  ;;  %s2394_s20 = int_to_ptr.vmem [resolvable:$true] %s326_s20 }
  0x90   : > { %p2390_p11 = pnand %p1753_p4, %p43_p2  ;;  %s2396_s22 = scalar_lea.sflag [#allocation3], %s315_s25 }
  0x91   : > { %s2016_s9 = scalar_lea.hbm %s2388_s17, 256  ;;  %s2021_s19 = scalar_lea.hbm %s2636_s0, 512 }
  0x92   : > { %p2017_p12 = scmp.ne.s32.totalorder %s2388_s17, %s2016_s9  ;;  %p2018_p8 = pneg %p2390_p11 }
  0x93   : > { %p2022_p13 = scmp.lt.u32.totalorder %s2388_s17, %s2636_s0  ;;  %p2023_p0 = scmp.lt.u32.totalorder %s2021_s19, %s2016_s9 }
  0x94   : > { %p2019_p1 = pnand %p2018_p8, %p2017_p12  ;;  %p2025_p5 = scmp.lt.u32.totalorder %s2016_s9, %s2388_s17 }
  0x95   : > { %p2024_p2 = por %p2023_p0, %p2022_p13 }
  0x96   : > { %p2020_p3 = pneg %p2019_p1 }
  0x97   : > { %p2026_p9 = por %p2025_p5, %p2024_p2 }
  0x99   : > { %p2027_p4 = pnand %p2026_p9, %p2020_p3 }
  0x9b   : > { %2030 = shalt.err (!%p2027_p4)
}
  0x9c   : > { %s2031_s25 = scalar_lea.vmem %s2394_s20, 256  ;;  %s2135_s14 = smov [#allocation2]  }
  0x9d   : > { %p2032_p12 = scmp.ne.s32.totalorder %s2394_s20, %s2031_s25  ;;  %s2036_s10 = sshll.u32 %s2135_s14, 4  ;;  %s2037_s10 = int_to_ptr.vmem [resolvable:$false] %s2036_s10 }
  0x9e   : > { %s2038_s23 = scalar_lea.vmem %s2037_s10, 512  ;;  %p2039_p6 = scmp.lt.s32.totalorder %s2394_s20, %s2037_s10 }
  0x9f   : > { %p2034_p1 = pnand %p2032_p12, %p2018_p8  ;;  %p2040_p13 = scmp.lt.s32.totalorder %s2038_s23, %s2031_s25 }
  0xa1   : > { %p2035_p10 = pneg %p2034_p1  ;;  %p2041_p0 = por %p2040_p13, %p2039_p6 }
  0xa3   : > { %p2042_p2 = pnand %p2041_p0, %p2035_p10 }
  0xa5   : > { %2045 = shalt.err (!%p2042_p2)
}
  0xa6   : > { %s2659_s9 = smov 64   ;;  %p2660_p8 = scmp.ne.s32.totalorder %s2650_s12, 0 }
  0xa7   : > { %1743 = dma.hbm_to_vmem [thread:$0]  (!%p2390_p11), %s2388_s17, 256, %s2394_s20, %s2396_s22, %s2659_s9, %s2659_s9, %s2130_s13  }
  0xa8   : > { %338 = sbr.rel (%p2660_p8) target bundleno = 1398 (0x576), region = 52  ;;  %s2430_s19 = sand.u32 (!%p2660_p8), 1, %s2116_s28  }
  0xa9   : > { %s1443_s1 = sshll.u32 (!%p2660_p8), %s2430_s19, 4  ;;  %s341_s25 = scalar_lea.sflag (!%p2660_p8), [#allocation3], %s2430_s19 }
  0xaa   : > { %s2436_s16 = scalar_lea.vmem (!%p2660_p8), [#allocation2], %s1443_s1 }
  0xaf   : > { %2091 = dma.done.wait (%p2370_p7), %s341_s25, 256  }
  0xb0   : > { %2093 = vsyncadd (%p2370_p7), %s341_s25, 4294967040  ;;  %p2661_p6 = scmp.eq.s32.totalorder %s2205_s11, 0 }
  0xb2   : > { %2095 = dma.done.wait (%p2661_p6), [#allocation6], 2048   ;;  %p2662_p10 = pmov %p2661_p6 }
  0xb3   : > { %p2663_p11 = pmov %p2661_p6 }
  0xb4   : > { %2097 = vsyncadd (%p2662_p10), [#allocation6], 4294965248 }
  0xb5   : > { %2099 = dma.done.wait (%p2663_p11), [#allocation9], 2048   ;;  %p2664_p3 = pmov %p2661_p6 }
  0xb7   : > { %2101 = vsyncadd (%p2664_p3), [#allocation9], 4294965248  ;;  %p2665_p5 = pmov %p2664_p3 }
  0xb8   : > { %p2666_p9 = pmov %p2664_p3 }
  0xb9   : > { %2103 = dma.done.wait (%p2665_p5), [#allocation12], 2048  }
  0xba   : > { %2105 = vsyncadd (%p2666_p9), [#allocation12], 4294965248  ;;  %v1804_v0 = vld [vmem:[#allocation7] sm:$0xff]   ;;  %v1805_v1 = vld [vmem:[#allocation7 + $0x8] sm:$0xff]   ;;  %vm698_vm0 = vcmask 261120   ;;  %s396_s20 = scalar_lea.vmem [#allocation13], %s1443_s1 }
  0xbb   : > { %1600 = vmatprep.subr.bf16.mxu1 %v1804_v0  ;;  %v1806_v2 = vld [vmem:[#allocation7 + $0x10] sm:$0xff]   ;;  %v1807_v3 = vld [vmem:[#allocation7 + $0x18] sm:$0xff]   ;;  %v1814_v5 = vld [vmem:[#allocation5] sm:$0xff]   ;;  %s1310_s22 = sshll.u32 %s396_s20, 4  ;;  %s1508_s14 = sshll.u32 %s2205_s11, 8  ;;  %s2587_s22 = int_to_ptr.vmem [resolvable:$true] %s1310_s22 }
  0xbc   : > { %1601 = vmatpush3.bf16.msra.mxu1 %v1804_v0  ;;  %v1812_v4 = vld [vmem:[%s2436_s16] sm:$0xff]   ;;  %v1815_v6 = vld [vmem:[#allocation5 + $0x8] sm:$0xff]   ;;  %1580 = vmatprep.subr.bf16.mxu0 %v1814_v5  ;;  %v1817_v10 = vld [vmem:[#allocation5 + $0x18] sm:$0xff]   ;;  %s2592_s9 = scalar_lea.hbm %s2644_s8, %s1508_s14  ;;  %s1297_s1 = scalar_lea.sflag [#allocation4], %s2430_s19 }
  0xbd   : > { %1602 = vmatprep.subr.bf16.mxu1 %v1805_v1  ;;  %1616 = vmatprep.mubr.bf16.mxu1 %v1812_v4  ;;  %v1808_v7 = vld [vmem:[#allocation7 + $0x20] sm:$0xff]   ;;  %v1816_v8 = vld [vmem:[#allocation5 + $0x10] sm:$0xff]   ;;  %v1809_v9 = vld [vmem:[#allocation7 + $0x28] sm:$0xff]   ;;  %s2046_s25 = scalar_lea.vmem %s2587_s22, 256  ;;  %p2667_p4 = scmp.ne.s32.totalorder %s2656_s21, 0 }
  0xbe   : > { %1596 = vmatprep.mubr.bf16.mxu0 %v1812_v4  ;;  %1581 = vmatpush3.bf16.msra.mxu0 %v1814_v5  ;;  %v1810_v11 = vld [vmem:[#allocation7 + $0x30] sm:$0xff]   ;;  %v1818_v12 = vld [vmem:[#allocation5 + $0x20] sm:$0xff]   ;;  %v1811_v13 = vld [vmem:[#allocation7 + $0x38] sm:$0xff]   ;;  %p2047_p7 = scmp.ne.s32.totalorder %s2587_s22, %s2046_s25  ;;  %s2136_s11 = smov [#allocation13]  }
  0xbf   : > { %1582 = vmatprep.subr.bf16.mxu0 %v1815_v6  ;;  %v1819_v14 = vld [vmem:[#allocation5 + $0x28] sm:$0xff]   ;;  %v1820_v16 = vld [vmem:[#allocation5 + $0x30] sm:$0xff]   ;;  %v1821_v17 = vld [vmem:[#allocation5 + $0x38] sm:$0xff]  }
  0xc0   : > { %1603 = vmatpush3.bf16.msra.mxu1 %v1805_v1  ;;  %v2456_v15 = vld [vmem:[%s2436_s16 + $0x8] sm:$0xff]   ;;  %v1822_v61 = vld [vmem:[#allocation8] sm:$0xff]   ;;  %p2048_p12 = pnand %p2047_p7, %p2667_p4  ;;  %s2050_s16 = sshll.u32 %s2136_s11, 4  ;;  %s2051_s16 = int_to_ptr.vmem [resolvable:$false] %s2050_s16 }
  0xc1   : > { %1604 = vmatprep.subr.bf16.mxu1 %v1806_v2  ;;  %v1823_v62 = vld [vmem:[#allocation8 + $0x8] sm:$0xff]   ;;  %s2052_s12 = scalar_lea.vmem %s2051_s16, 512  ;;  %p2053_p13 = scmp.lt.s32.totalorder %s2587_s22, %s2051_s16 }
  0xc2   : > { %1583 = vmatpush3.bf16.msra.mxu0 %v1815_v6  ;;  %p2049_p1 = pneg %p2048_p12  ;;  %p2054_p0 = scmp.lt.s32.totalorder %s2052_s12, %s2046_s25 }
  0xc3   : > { %1584 = vmatprep.subr.bf16.mxu0 %v1816_v8 }
  0xc4   : > { %1605 = vmatpush3.bf16.msra.mxu1 %v1806_v2  ;;  %p2055_p2 = por %p2054_p0, %p2053_p13 }
  0xc5   : > { %1606 = vmatprep.subr.bf16.mxu1 %v1807_v3 }
  0xc6   : > { %1585 = vmatpush3.bf16.msra.mxu0 %v1816_v8  ;;  %v1826_v8 = vld [vmem:[#allocation8 + $0x20] sm:$0xff]   ;;  %p2056_p8 = pnand %p2055_p2, %p2049_p1 }
  0xc7   : > { %1586 = vmatprep.subr.bf16.mxu0 %v1817_v10 }
  0xc8   : > { %1607 = vmatpush3.bf16.msra.mxu1 %v1807_v3 }
  0xc9   : > { %1608 = vmatprep.subr.bf16.mxu1 %v1808_v7 }
  0xca   : > { %1587 = vmatpush3.bf16.msra.mxu0 %v1817_v10  ;;  %v1828_v10 = vld [vmem:[#allocation8 + $0x30] sm:$0xff]  }
  0xcb   : > { %1588 = vmatprep.subr.bf16.mxu0 %v1818_v12 }
  0xcc   : > { %1609 = vmatpush3.bf16.msra.mxu1 %v1808_v7  ;;  %v1825_v7 = vld [vmem:[#allocation8 + $0x18] sm:$0xff]  }
  0xcd   : > { %1610 = vmatprep.subr.bf16.mxu1 %v1809_v9 }
  0xce   : > { %1589 = vmatpush3.bf16.msra.mxu0 %v1818_v12 }
  0xcf   : > { %1590 = vmatprep.subr.bf16.mxu0 %v1819_v14 }
  0xd0   : > { %1611 = vmatpush3.bf16.msra.mxu1 %v1809_v9  ;;  %v1827_v9 = vld [vmem:[#allocation8 + $0x28] sm:$0xff]  }
  0xd1   : > { %1612 = vmatprep.subr.bf16.mxu1 %v1810_v11 }
  0xd2   : > { %1591 = vmatpush3.bf16.msra.mxu0 %v1819_v14 }
  0xd3   : > { %1592 = vmatprep.subr.bf16.mxu0 %v1820_v16 }
  0xd4   : > { %1613 = vmatpush3.bf16.msra.mxu1 %v1810_v11  ;;  %v1829_v11 = vld [vmem:[#allocation8 + $0x38] sm:$0xff]  }
  0xd5   : > { %1614 = vmatprep.subr.bf16.mxu1 %v1811_v13 }
  0xd6   : > { %1593 = vmatpush3.bf16.msra.mxu0 %v1820_v16 }
  0xd7   : > { %1594 = vmatprep.subr.bf16.mxu0 %v1821_v17 }
  0xd8   : > { %1615 = vmatpush3.bf16.msra.mxu1 %v1811_v13 }
  0xd9   : > { %1640 = vmatprep.subr.bf16.mxu1 %v1822_v61 }
  0xda   : > { %1595 = vmatpush3.bf16.msra.mxu0 %v1821_v17 }
  0xdb   : > { %1617 = vmatmul.mubr.bf16.vlgmr.msra.gmra.mrb[0].mxu1 %v2456_v15 }
  0xdc   : > { %1656 = vmatprep.mubr.bf16.mxu1 %v1812_v4  ;;  %1641 = vmatpush3.bf16.msra.mxu1 %v1822_v61  ;;  %v1824_v4 = vld [vmem:[#allocation8 + $0x10] sm:$0xff]   ;;  %v851_v61 = vld [vmem:[#allocation11 + $0x40] sm:$0xff] }
  0xdd   : > { %1597 = vmatmul.mubr.bf16.vlgmr.msra.gmra.mrb[0].mxu0 %v2456_v15  ;;  %1642 = vmatprep.subr.bf16.mxu1 %v1823_v62 }
  0xe0   : > { %1643 = vmatpush3.bf16.msra.mxu1 %v1823_v62 }
  0xe1   : > { %1644 = vmatprep.subr.bf16.mxu1 %v1824_v4 }
  0xe4   : > { %1645 = vmatpush3.bf16.msra.mxu1 %v1824_v4  ;;  %v852_v4 = vld [vmem:[#allocation11 + $0x48] sm:$0xff] }
  0xe5   : > { %1646 = vmatprep.subr.bf16.mxu1 %v1825_v7 }
  0xe8   : > { %1647 = vmatpush3.bf16.msra.mxu1 %v1825_v7 }
  0xe9   : > { %1648 = vmatprep.subr.bf16.mxu1 %v1826_v8 }
  0xec   : > { %1649 = vmatpush3.bf16.msra.mxu1 %v1826_v8 }
  0xed   : > { %1650 = vmatprep.subr.bf16.mxu1 %v1827_v9 }
  0xf0   : > { %1651 = vmatpush3.bf16.msra.mxu1 %v1827_v9 }
  0xf1   : > { %1652 = vmatprep.subr.bf16.mxu1 %v1828_v10 }
  0xf4   : > { %1653 = vmatpush3.bf16.msra.mxu1 %v1828_v10 }
  0xf5   : > { %1654 = vmatprep.subr.bf16.mxu1 %v1829_v11 }
  0xf8   : > { %1655 = vmatpush3.bf16.msra.mxu1 %v1829_v11 }
  0xfb   : > { %1657 = vmatmul.mubr.bf16.vlgmr.msra.gmra.mrb[4].mxu1 %v2456_v15 }
 0x1ae   : > { %v1618_v18 = vpop.f32.mrb[0].mxu1 }
 0x1af   : > { %v625_v19 = vpop.f32.mrb[1].mxu1  ;;  %v657_v24 = vmul.f32 %v1618_v18, %v1618_v18 }
 0x1b0   : > { %v1619_v20 = vpop.f32.mrb[2].mxu1  ;;  %v655_v22 = vmul.f32 %v625_v19, %v625_v19  ;;  %v1598_v29 = vpop.f32.mrb[0].mxu0 }
 0x1b1   : > { %v628_v21 = vpop.f32.mrb[3].mxu1  ;;  %v658_v26 = vmul.f32 %v1619_v20, %v1619_v20  ;;  %v512_v30 = vpop.f32.mrb[1].mxu0  ;;  %v642_v36 = vmul.f32 %v1598_v29, %v1598_v29 }
 0x1b2   : > { %v656_v23 = vmul.f32 %v628_v21, %v628_v21  ;;  %v640_v32 = vmul.f32 %v512_v30, %v512_v30  ;;  %v1599_v33 = vpop.f32.mrb[2].mxu0 }
 0x1b3   : > { %v515_v34 = vpop.f32.mrb[3].mxu0  ;;  %v643_v39 = vmul.f32 %v1599_v33, %v1599_v33 }
 0x1b4   : > { %v659_v25 = vadd.f32 %v656_v23, %v655_v22  ;;  %v641_v37 = vmul.f32 %v515_v34, %v515_v34 }
 0x1b6   : > { %v660_v27 = vadd.f32 %v659_v25, %v657_v24  ;;  %v644_v40 = vadd.f32 %v641_v37, %v640_v32  ;;  %v2472_v24 = vld [vmem:[%s2642_s6] ss:$0 sm:$0xff] }
 0x1b8   : > { %v661_v28 = vadd.f32 %v660_v27, %v658_v26  ;;  %v645_v42 = vadd.f32 %v644_v40, %v642_v36  ;;  %v845_v26 = vld [vmem:[#allocation11 + $0x10] sm:$0xff] }
 0x1ba   : > { %v662_v31 = vrot.slane %v661_v28, 4  ;;  %v646_v44 = vadd.f32 %v645_v42, %v643_v39  ;;  %v850_v39 = vld [vmem:[#allocation11 + $0x38] sm:$0xff] }
 0x1bc   : > { %v663_v35 = vadd.f32 %v662_v31, %v661_v28  ;;  %v647_v46 = vrot.slane %v646_v44, 4 }
 0x1be   : > { %v664_v38 = vrot.slane %v663_v35, 2  ;;  %v648_v48 = vadd.f32 %v647_v46, %v646_v44 }
 0x1c0   : > { %v665_v41 = vadd.f32 %v664_v38, %v663_v35  ;;  %v649_v49 = vrot.slane %v648_v48, 2  ;;  %v846_v35 = vld [vmem:[#allocation11 + $0x18] sm:$0xff] }
 0x1c2   : > { %v666_v43 = vrot.slane %v665_v41, 1  ;;  %v650_v50 = vadd.f32 %v649_v49, %v648_v48 }
 0x1c4   : > { %v667_v45 = vadd.f32 %v666_v43, %v665_v41  ;;  %v651_v51 = vrot.slane %v650_v50, 1  ;;  %v844_v41 = vld [vmem:[#allocation11 + $0x8] sm:$0xff] }
 0x1c6   : > { %v668_v47 = vmax.f32 %v667_v45, 1e-24  ;;  %v652_v52 = vadd.f32 %v651_v51, %v650_v50  ;;  %v848_v45 = vld [vmem:[#allocation11 + $0x28] sm:$0xff] }
 0x1c8   : > { %1838 = vrsqrt.f32 %v668_v47  ;;  %v653_v53 = vmax.f32 %v652_v52, 1e-24 }
 0x1ca   : > { %1840 = vrsqrt.f32 %v653_v53 }
 0x1d2   : > { %v1839_v54 = vpop.eup %1838 }
 0x1d3   : > { %v677_v55 = vmul.f32 %v1839_v54, %v628_v21  ;;  %v676_v56 = vmul.f32 %v1839_v54, %v625_v19  ;;  %v678_v57 = vmul.f32 %v1839_v54, %v1618_v18  ;;  %v679_v58 = vmul.f32 %v1839_v54, %v1619_v20 }
 0x1d4   : > { %v1841_v63 = vpop.eup %1840 }
 0x1d5   : > { %v680_v59 = vpack.c.bf16 %v677_v55, %v676_v56  ;;  %v681_v60 = vpack.c.bf16 %v679_v58, %v678_v57  ;;  %v670_v0 = vmul.f32 %v1841_v63, %v512_v30  ;;  %v671_v1 = vmul.f32 %v1841_v63, %v515_v34  ;;  %v843_v30 = vld [vmem:[#allocation11] sm:$0xff]  ;;  %v853_v58 = vld [vmem:[#allocation11 + $0x50] sm:$0xff] }
 0x1d6   : > { %v672_v2 = vmul.f32 %v1841_v63, %v1598_v29  ;;  %v673_v3 = vmul.f32 %v1841_v63, %v1599_v33  ;;  %v849_v29 = vld [vmem:[#allocation11 + $0x30] sm:$0xff]  ;;  %v847_v34 = vld [vmem:[#allocation11 + $0x20] sm:$0xff] }
 0x1d7   : > { %682 = vxpose.xlu0.c.b16.start [1/2] (short) %v680_v59, 128  ;;  %v674_v5 = vpack.c.bf16 %v671_v1, %v670_v0  ;;  %v854_v0 = vld [vmem:[#allocation11 + $0x58] sm:$0xff] }
 0x1d8   : > { %v675_v6 = vpack.c.bf16 %v673_v3, %v672_v2 }
 0x1d9   : > { %1620 = vmatprep.subr.bf16.mxu0 %v674_v5 }
 0x1da   : > { %1621 = vmatpush3.bf16.msra.mxu0 %v674_v5  ;;  %v2511_v5 = vpop.f32.mrb[4].mxu1 }
 0x1db   : > { %683 = vxpose.xlu0.c.b16.end [2/2] (short) %v681_v60, 128  ;;  %1622 = vmatprep.subr.bf16.mxu0 %v675_v6  ;;  %v1088_v8 = vpop.f32.mrb[5].mxu1 }
 0x1dc   : > { %v2519_v11 = vpop.f32.mrb[6].mxu1 }
 0x1de   : > { %1623 = vmatpush3.bf16.msra.mxu0 %v675_v6 }
 0x23d   : > { %v690_v12 = vpop.trf.xlu0 }
 0x23e   : > { %1624 = vmatprep.mubr.msk.bf16.mxu0 %vm698_vm0, %v690_v12 }
 0x241   : > { %v691_v13 = vpop.trf.xlu0 }
 0x242   : > { %1625 = vmatmul.mubr.msk.bf16.vlgmr.msra.gmra.mrb[4].mxu0 %vm698_vm0, %v691_v13 }
 0x245   : > { %v692_v14 = vpop.trf.xlu0 }
 0x246   : > { %1628 = vmatprep.mubr.msk.bf16.mxu0 %vm698_vm0, %v692_v14  ;;  %v1104_v14 = vpack.c.bf16 %v2519_v11, %v2511_v5 }
 0x249   : > { %v693_v16 = vpop.trf.xlu0 }
 0x24a   : > { %1629 = vmatmul.mubr.msk.bf16.gmra.mrb[8].mxu0 %vm698_vm0, %v693_v16  ;;  %v1091_v16 = vpop.f32.mrb[7].mxu1 }
 0x24d   : > { %v694_v17 = vpop.trf.xlu0 }
 0x24e   : > { %1632 = vmatprep.mubr.msk.bf16.mxu0 %vm698_vm0, %v694_v17 }
 0x251   : > { %v695_v18 = vpop.trf.xlu0 }
 0x252   : > { %1633 = vmatmul.mubr.msk.bf16.gmra.mrb[12].mxu0 %vm698_vm0, %v695_v18  ;;  %v1103_v18 = vpack.c.bf16 %v1091_v16, %v1088_v8 }
 0x255   : > { %v696_v15 = vpop.trf.xlu0 }
 0x256   : > { %1636 = vmatprep.mubr.msk.bf16.mxu0 %vm698_vm0, %v696_v15 }
 0x259   : > { %v697_v19 = vpop.trf.xlu0 }
 0x25a   : > { %1637 = vmatmul.mubr.msk.bf16.gmra.mrb[16].mxu0 %vm698_vm0, %v697_v19 }
 0x25b   : > { %1676 = vmatprep.mubr.bf16.mxu0 %v1103_v18 }
 0x315   : > { %v1626_v20 = vpop.f32.mrb[4].mxu0 }
 0x316   : > { %v757_v21 = vpop.f32.mrb[5].mxu0  ;;  %v829_v25 = vmul.f32 %v1626_v20, %v2472_v24  ;;  %v857_v20 = vld [vmem:[#allocation11 + $0x70] sm:$0xff] }
 0x317   : > { %v1627_v22 = vpop.f32.mrb[6].mxu0  ;;  %v827_v27 = vmul.f32 %v2472_v24, %v757_v21 }
 0x318   : > { %v760_v23 = vpop.f32.mrb[7].mxu0  ;;  %v830_v31 = vmul.f32 %v1627_v22, %v2472_v24  ;;  %v2480_v40 = vadd.f32 %v845_v26, %v829_v25 }
 0x319   : > { %v828_v36 = vmul.f32 %v2472_v24, %v760_v23  ;;  %v2485_v46 = vadd.f32 %v843_v30, %v827_v27  ;;  %v855_v23 = vld [vmem:[#allocation11 + $0x60] sm:$0xff]  ;;  %v858_v27 = vld [vmem:[#allocation11 + $0x78] sm:$0xff] }
 0x31a   : > { %v2490_v49 = vadd.f32 %v846_v35, %v830_v31  ;;  %v856_v31 = vld [vmem:[#allocation11 + $0x68] sm:$0xff] }
 0x31b   : > { %v2496_v52 = vadd.f32 %v844_v41, %v828_v36  ;;  %v1830_v36 = vld [vmem:[#allocation10] sm:$0xff]  }
 0x31c   : > { %1680 = vmatprep.subr.bf16.mxu1 %v1830_v36 }
 0x31d   : > { %v1630_v28 = vpop.f32.mrb[8].mxu0  ;;  %1681 = vmatpush3.bf16.msra.mxu1 %v1830_v36 }
 0x31e   : > { %v833_v32 = vmul.f32 %v1630_v28, %v2472_v24  ;;  %v773_v33 = vpop.f32.mrb[9].mxu0 }
 0x31f   : > { %v831_v37 = vmul.f32 %v2472_v24, %v773_v33  ;;  %v1631_v38 = vpop.f32.mrb[10].mxu0 }
 0x320   : > { %v2482_v42 = vadd.f32 %v849_v29, %v833_v32  ;;  %v834_v43 = vmul.f32 %v1631_v38, %v2472_v24  ;;  %v776_v44 = vpop.f32.mrb[11].mxu0 }
 0x321   : > { %v2487_v47 = vadd.f32 %v847_v34, %v831_v37  ;;  %v832_v48 = vmul.f32 %v2472_v24, %v776_v44  ;;  %v1831_v37 = vld [vmem:[#allocation10 + $0x8] sm:$0xff]  }
 0x322   : > { %v877_v50 = vmax.f32 %v2480_v40, %v2482_v42  ;;  %v2494_v51 = vadd.f32 %v850_v39, %v834_v43  ;;  %1682 = vmatprep.subr.bf16.mxu1 %v1831_v37 }
 0x323   : > { %v875_v53 = vmax.f32 %v2485_v46, %v2487_v47  ;;  %v2500_v54 = vadd.f32 %v848_v45, %v832_v48  ;;  %v1832_v45 = vld [vmem:[#allocation10 + $0x10] sm:$0xff]   ;;  %1683 = vmatpush3.bf16.msra.mxu1 %v1831_v37 }
 0x324   : > { %v878_v55 = vmax.f32 %v2490_v49, %v2494_v51  ;;  %1684 = vmatprep.subr.bf16.mxu1 %v1832_v45 }
 0x325   : > { %v876_v56 = vmax.f32 %v2496_v52, %v2500_v54  ;;  %v1634_v57 = vpop.f32.mrb[12].mxu0 }
 0x326   : > { %v837_v59 = vmul.f32 %v1634_v57, %v2472_v24  ;;  %v789_v60 = vpop.f32.mrb[13].mxu0 }
 0x327   : > { %v835_v62 = vmul.f32 %v2472_v24, %v789_v60  ;;  %v1635_v63 = vpop.f32.mrb[14].mxu0  ;;  %1685 = vmatpush3.bf16.msra.mxu1 %v1832_v45 }
 0x328   : > { %v2508_v1 = vadd.f32 %v853_v58, %v837_v59  ;;  %v838_v2 = vmul.f32 %v1635_v63, %v2472_v24  ;;  %v792_v3 = vpop.f32.mrb[15].mxu0  ;;  %v1835_v59 = vld [vmem:[#allocation10 + $0x28] sm:$0xff]  }
 0x329   : > { %v2513_v6 = vadd.f32 %v851_v61, %v835_v62  ;;  %v836_v7 = vmul.f32 %v2472_v24, %v792_v3  ;;  %v1836_v62 = vld [vmem:[#allocation10 + $0x30] sm:$0xff]  }
 0x32a   : > { %v881_v9 = vmax.f32 %v877_v50, %v2508_v1  ;;  %v2517_v10 = vadd.f32 %v854_v0, %v838_v2  ;;  %v1833_v50 = vld [vmem:[#allocation10 + $0x18] sm:$0xff]  }
 0x32b   : > { %v879_v12 = vmax.f32 %v875_v53, %v2513_v6  ;;  %v2522_v13 = vadd.f32 %v852_v4, %v836_v7  ;;  %1686 = vmatprep.subr.bf16.mxu1 %v1833_v50 }
 0x32c   : > { %v882_v17 = vmax.f32 %v878_v55, %v2517_v10  ;;  %1687 = vmatpush3.bf16.msra.mxu1 %v1833_v50 }
 0x32d   : > { %v880_v15 = vmax.f32 %v876_v56, %v2522_v13  ;;  %v1638_v19 = vpop.f32.mrb[16].mxu0  ;;  %v1834_v56 = vld [vmem:[#allocation10 + $0x20] sm:$0xff]  }
 0x32e   : > { %v841_v21 = vmul.f32 %v1638_v19, %v2472_v24  ;;  %v805_v22 = vpop.f32.mrb[17].mxu0  ;;  %1688 = vmatprep.subr.bf16.mxu1 %v1834_v56 }
 0x32f   : > { %v839_v25 = vmul.f32 %v2472_v24, %v805_v22  ;;  %v1639_v26 = vpop.f32.mrb[18].mxu0 }
 0x330   : > { %v2530_v28 = vadd.f32 %v857_v20, %v841_v21  ;;  %v842_v29 = vmul.f32 %v1639_v26, %v2472_v24  ;;  %v808_v30 = vpop.f32.mrb[19].mxu0  ;;  %1689 = vmatpush3.bf16.msra.mxu1 %v1834_v56 }
 0x331   : > { %v2533_v32 = vadd.f32 %v855_v23, %v839_v25  ;;  %v840_v33 = vmul.f32 %v2472_v24, %v808_v30  ;;  %1690 = vmatprep.subr.bf16.mxu1 %v1835_v59 }
 0x332   : > { %v885_v34 = vmax.f32 %v881_v9, %v2530_v28  ;;  %v2537_v35 = vadd.f32 %v858_v27, %v842_v29 }
 0x333   : > { %v883_v38 = vmax.f32 %v879_v12, %v2533_v32  ;;  %v2540_v39 = vadd.f32 %v856_v31, %v840_v33 }
 0x334   : > { %v886_v41 = vmax.f32 %v882_v17, %v2537_v35  ;;  %1691 = vmatpush3.bf16.msra.mxu1 %v1835_v59 }
 0x335   : > { %v884_v43 = vmax.f32 %v880_v15, %v2540_v39  ;;  %1692 = vmatprep.subr.bf16.mxu1 %v1836_v62 }
 0x336   : > { %v888_v44 = vmax.f32 %v885_v34, %v886_v41 }
 0x337   : > { %v887_v24 = vmax.f32 %v883_v38, %v884_v43 }
 0x338   : > { %1693 = vmatpush3.bf16.msra.mxu1 %v1836_v62 }
 0x339   : > { %v889_v48 = vmax.f32 %v887_v24, %v888_v44 }
 0x33b   : > { %v890_v53 = vrot.slane %v889_v48, 4 }
 0x33d   : > { %v891_v55 = vmax.f32 %v889_v48, %v890_v53 }
 0x33f   : > { %v892_v57 = vrot.slane %v891_v55, 2 }
 0x341   : > { %v893_v58 = vmax.f32 %v891_v55, %v892_v57 }
 0x343   : > { %v894_v60 = vrot.slane %v893_v58, 1 }
 0x345   : > { %v2544_v61 = vmax.f32 %v893_v58, %v894_v60 }
 0x347   : > { %v896_v63 = vsub.f32 %v2485_v46, %v2544_v61  ;;  %v897_v0 = vsub.f32 %v2496_v52, %v2544_v61  ;;  %v898_v2 = vsub.f32 %v2480_v40, %v2544_v61  ;;  %v899_v3 = vsub.f32 %v2490_v49, %v2544_v61 }
 0x348   : > { %v900_v4 = vsub.f32 %v2487_v47, %v2544_v61  ;;  %v901_v7 = vsub.f32 %v2500_v54, %v2544_v61  ;;  %v902_v8 = vsub.f32 %v2482_v42, %v2544_v61  ;;  %v903_v46 = vsub.f32 %v2494_v51, %v2544_v61 }
 0x349   : > { %v904_v52 = vsub.f32 %v2513_v6, %v2544_v61  ;;  %v905_v40 = vsub.f32 %v2522_v13, %v2544_v61  ;;  %v906_v49 = vsub.f32 %v2508_v1, %v2544_v61  ;;  %v907_v47 = vsub.f32 %v2517_v10, %v2544_v61 }
 0x34a   : > { %v908_v54 = vsub.f32 %v2533_v32, %v2544_v61  ;;  %v909_v42 = vsub.f32 %v2540_v39, %v2544_v61  ;;  %v910_v51 = vsub.f32 %v2530_v28, %v2544_v61  ;;  %v911_v6 = vsub.f32 %v2537_v35, %v2544_v61 }
 0x34b   : > { %v912_v9 = vmul.f32 1.442695, %v896_v63  ;;  %v914_v12 = vmul.f32 1.442695, %v897_v0  ;;  %v916_v1 = vmul.f32 1.442695, %v898_v2 }
 0x34c   : > { %v918_v10 = vmul.f32 1.442695, %v899_v3  ;;  %v920_v13 = vmul.f32 1.442695, %v900_v4  ;;  %v922_v16 = vmul.f32 1.442695, %v901_v7 }
 0x34d   : > { %1842 = vpow2.f32 %v912_v9  ;;  %v924_v17 = vmul.f32 1.442695, %v902_v8  ;;  %v926_v18 = vmul.f32 1.442695, %v903_v46  ;;  %v928_v20 = vmul.f32 1.442695, %v904_v52 }
 0x34e   : > { %1844 = vpow2.f32 %v914_v12  ;;  %v930_v23 = vmul.f32 1.442695, %v905_v40  ;;  %v932_v27 = vmul.f32 1.442695, %v906_v49  ;;  %v934_v30 = vmul.f32 1.442695, %v907_v47 }
 0x34f   : > { %1846 = vpow2.f32 %v916_v1  ;;  %v936_v33 = vmul.f32 1.442695, %v908_v54  ;;  %v938_v36 = vmul.f32 1.442695, %v909_v42  ;;  %v940_v39 = vmul.f32 1.442695, %v910_v51 }
 0x350   : > { %1848 = vpow2.f32 %v918_v10  ;;  %v942_v44 = vmul.f32 1.442695, %v911_v6 }
 0x351   : > { %1850 = vpow2.f32 %v920_v13 }
 0x352   : > { %1852 = vpow2.f32 %v922_v16 }
 0x353   : > { %1854 = vpow2.f32 %v924_v17 }
 0x354   : > { %1856 = vpow2.f32 %v926_v18 }
 0x355   : > { %1858 = vpow2.f32 %v928_v20 }
 0x356   : > { %1860 = vpow2.f32 %v930_v23 }
 0x357   : > { %v1843_v15 = vpop.eup %1842  ;;  %1862 = vpow2.f32 %v932_v27 }
 0x358   : > { %v1845_v19 = vpop.eup %1844  ;;  %1864 = vpow2.f32 %v934_v30 }
 0x359   : > { %v944_v21 = vadd.f32 %v1845_v19, %v1843_v15  ;;  %v1847_v22 = vpop.eup %1846  ;;  %1866 = vpow2.f32 %v936_v33 }
 0x35a   : > { %v1849_v26 = vpop.eup %1848  ;;  %1868 = vpow2.f32 %v938_v36  ;;  %v1485_v36 = vld [vmem:[%s2641_s5] ss:$0 sm:$0xff] }
 0x35b   : > { %v945_v25 = vadd.f32 %v1847_v22, %v944_v21  ;;  %v1851_v29 = vpop.eup %1850  ;;  %1870 = vpow2.f32 %v940_v39 }
 0x35c   : > { %v1853_v32 = vpop.eup %1852  ;;  %1872 = vpow2.f32 %v942_v44 }
 0x35d   : > { %v946_v28 = vadd.f32 %v1849_v26, %v945_v25  ;;  %v1855_v35 = vpop.eup %1854 }
 0x35e   : > { %v1857_v38 = vpop.eup %1856 }
 0x35f   : > { %v947_v31 = vadd.f32 %v1851_v29, %v946_v28  ;;  %v1859_v43 = vpop.eup %1858  ;;  %v1837_v28 = vld [vmem:[#allocation10 + $0x38] sm:$0xff]  }
 0x360   : > { %v1861_v24 = vpop.eup %1860  ;;  %1694 = vmatprep.subr.bf16.mxu1 %v1837_v28 }
 0x361   : > { %v948_v34 = vadd.f32 %v1853_v32, %v947_v31  ;;  %v1863_v50 = vpop.eup %1862  ;;  %1695 = vmatpush3.bf16.msra.mxu1 %v1837_v28 }
 0x362   : > { %v1865_v55 = vpop.eup %1864 }
 0x363   : > { %v949_v37 = vadd.f32 %v1855_v35, %v948_v34  ;;  %v1867_v57 = vpop.eup %1866 }
 0x364   : > { %v1869_v59 = vpop.eup %1868 }
 0x365   : > { %v950_v41 = vadd.f32 %v1857_v38, %v949_v37  ;;  %v1871_v61 = vpop.eup %1870 }
 0x366   : > { %v1873_v63 = vpop.eup %1872 }
 0x367   : > { %v951_v45 = vadd.f32 %v1859_v43, %v950_v41 }
 0x369   : > { %v952_v48 = vadd.f32 %v1861_v24, %v951_v45 }
 0x36b   : > { %v953_v53 = vadd.f32 %v1863_v50, %v952_v48 }
 0x36d   : > { %v954_v56 = vadd.f32 %v1865_v55, %v953_v53 }
 0x36f   : > { %v955_v58 = vadd.f32 %v1867_v57, %v954_v56 }
 0x371   : > { %v956_v60 = vadd.f32 %v1869_v59, %v955_v58 }
 0x373   : > { %v957_v62 = vadd.f32 %v1871_v61, %v956_v60 }
 0x375   : > { %v958_v0 = vadd.f32 %v1873_v63, %v957_v62 }
 0x377   : > { %v959_v2 = vrot.slane %v958_v0, 4 }
 0x379   : > { %v960_v3 = vadd.f32 %v959_v2, %v958_v0 }
 0x37b   : > { %v961_v4 = vrot.slane %v960_v3, 2 }
 0x37d   : > { %v962_v7 = vadd.f32 %v961_v4, %v960_v3 }
 0x37f   : > { %v963_v8 = vrot.slane %v962_v7, 1 }
 0x381   : > { %v964_v46 = vadd.f32 %v963_v8, %v962_v7 }
 0x383   : > { %1874 = vrcp.f32 %v964_v46 }
 0x38d   : > { %v1875_v52 = vpop.eup %1874 }
 0x38e   : > { %v966_v40 = vmul.f32 %v1875_v52, %v1843_v15  ;;  %v967_v49 = vmul.f32 %v1875_v52, %v1845_v19  ;;  %v968_v47 = vmul.f32 %v1875_v52, %v1847_v22  ;;  %v969_v54 = vmul.f32 %v1875_v52, %v1849_v26 }
 0x38f   : > { %v970_v42 = vmul.f32 %v1875_v52, %v1851_v29  ;;  %v971_v51 = vmul.f32 %v1875_v52, %v1853_v32  ;;  %v972_v6 = vmul.f32 %v1875_v52, %v1855_v35  ;;  %v973_v9 = vmul.f32 %v1875_v52, %v1857_v38 }
 0x390   : > { %v982_v12 = vpack.c.bf16 %v967_v49, %v966_v40  ;;  %v983_v1 = vpack.c.bf16 %v969_v54, %v968_v47  ;;  %v974_v10 = vmul.f32 %v1875_v52, %v1859_v43  ;;  %v975_v13 = vmul.f32 %v1875_v52, %v1861_v24 }
 0x391   : > { %v984_v16 = vpack.c.bf16 %v971_v51, %v970_v42  ;;  %v985_v17 = vpack.c.bf16 %v973_v9, %v972_v6  ;;  %v976_v18 = vmul.f32 %v1875_v52, %v1863_v50  ;;  %v977_v20 = vmul.f32 %v1875_v52, %v1865_v55 }
 0x392   : > { %1660 = vmatprep.subr.bf16.mxu0 %v982_v12  ;;  %v986_v21 = vpack.c.bf16 %v975_v13, %v974_v10  ;;  %v978_v23 = vmul.f32 %v1875_v52, %v1867_v57  ;;  %v979_v25 = vmul.f32 %v1875_v52, %v1869_v59  ;;  %v980_v15 = vmul.f32 %v1875_v52, %v1871_v61 }
 0x393   : > { %1661 = vmatpush3.bf16.msra.mxu0 %v982_v12  ;;  %v987_v19 = vpack.c.bf16 %v977_v20, %v976_v18  ;;  %v981_v22 = vmul.f32 %v1875_v52, %v1873_v63 }
 0x394   : > { %1662 = vmatprep.subr.bf16.mxu0 %v983_v1  ;;  %v988_v26 = vpack.c.bf16 %v979_v25, %v978_v23 }
 0x395   : > { %v989_v27 = vpack.c.bf16 %v981_v22, %v980_v15 }
 0x397   : > { %1663 = vmatpush3.bf16.msra.mxu0 %v983_v1 }
 0x398   : > { %1664 = vmatprep.subr.bf16.mxu0 %v984_v16 }
 0x39b   : > { %1665 = vmatpush3.bf16.msra.mxu0 %v984_v16 }
 0x39c   : > { %1666 = vmatprep.subr.bf16.mxu0 %v985_v17 }
 0x39f   : > { %1667 = vmatpush3.bf16.msra.mxu0 %v985_v17 }
 0x3a0   : > { %1668 = vmatprep.subr.bf16.mxu0 %v986_v21 }
 0x3a3   : > { %1669 = vmatpush3.bf16.msra.mxu0 %v986_v21 }
 0x3a4   : > { %1670 = vmatprep.subr.bf16.mxu0 %v987_v19 }
 0x3a7   : > { %1671 = vmatpush3.bf16.msra.mxu0 %v987_v19 }
 0x3a8   : > { %1672 = vmatprep.subr.bf16.mxu0 %v988_v26 }
 0x3ab   : > { %1673 = vmatpush3.bf16.msra.mxu0 %v988_v26 }
 0x3ac   : > { %1674 = vmatprep.subr.bf16.mxu0 %v989_v27 }
 0x3af   : > { %1675 = vmatpush3.bf16.msra.mxu0 %v989_v27 }
 0x3b2   : > { %1677 = vmatmul.mubr.bf16.vlgmr.msra.gmra.mrb[20].mxu0 %v1104_v14 }
 0x485   : > { %v1678_v29 = vpop.f32.mrb[20].mxu0 }
 0x486   : > { %v1139_v30 = vpop.f32.mrb[21].mxu0 }
 0x487   : > { %v1679_v31 = vpop.f32.mrb[22].mxu0 }
 0x488   : > { %v1155_v32 = vpack.c.bf16 %v1679_v31, %v1678_v29  ;;  %v1142_v33 = vpop.f32.mrb[23].mxu0 }
 0x489   : > { %v1154_v34 = vpack.c.bf16 %v1142_v33, %v1139_v30 }
 0x48b   : > { %1696 = vmatprep.mubr.bf16.mxu1 %v1154_v34 }
 0x48c   : > { %1697 = vmatmul.mubr.bf16.vlgmr.msra.gmra.mrb[8].mxu1 %v1155_v32 }
 0x55f   : > { %v1698_v35 = vpop.f32.mrb[8].mxu1 }
 0x560   : > { %v1261_v5 = vpop.f32.mrb[9].mxu1  ;;  %v1270_v14 = vadd.f32 %v1698_v35, %v1485_v36 }
 0x561   : > { %v1699_v11 = vpop.f32.mrb[10].mxu1  ;;  %v1262_v39 = vadd.f32 %v1485_v36, %v1261_v5 }
 0x562   : > { %v1273_v37 = vadd.f32 %v1699_v11, %v1485_v36  ;;  %v1264_v38 = vpop.f32.mrb[11].mxu1 }
 0x563   : > { %v1265_v41 = vadd.f32 %v1485_v36, %v1264_v38 }
 0x564   : > { %v1517_v43 = vpack.c.bf16 %v1273_v37, %v1270_v14 }
 0x565   : > { %v1512_v44 = vpack.c.bf16 %v1265_v41, %v1262_v39 }
 0x566   : > { %1519 = vst [vmem:[%s396_s20 + $0x8] sm:$0xff] %v1517_v43  }
 0x567   : > { %1513 = vst [vmem:[%s396_s20] sm:$0xff] %v1512_v44  }
 0x568   : > { %2059 = shalt.err (!%p2056_p8)
}
 0x569   : > { %s2060_s13 = scalar_lea.hbm %s2592_s9, 256  ;;  %s2064_s20 = scalar_lea.hbm %s2644_s8, 512 }
 0x56a   : > { %p2061_p6 = scmp.ne.s32.totalorder %s2592_s9, %s2060_s13  ;;  %p2065_p3 = scmp.lt.u32.totalorder %s2592_s9, %s2644_s8 }
 0x56b   : > { %p2066_p5 = scmp.lt.u32.totalorder %s2064_s20, %s2060_s13  ;;  %p2068_p7 = scmp.lt.u32.totalorder %s2060_s13, %s2592_s9 }
 0x56c   : > { %p2062_p10 = pnand %p2061_p6, %p2667_p4 }
 0x56d   : > { %p2067_p9 = por %p2066_p5, %p2065_p3 }
 0x56e   : > { %p2063_p11 = pneg %p2062_p10 }
 0x56f   : > { %p2069_p12 = por %p2068_p7, %p2067_p9 }
 0x571   : > { %p2070_p1 = pnand %p2069_p12, %p2063_p11 }
 0x573   : > { %2073 = shalt.err (!%p2070_p1)
}
 0x574   : > { %s2137_s23 = smov 64   ;;  %s2138_s25 = smov 4  }
 0x575   : > { %1722 = dma.vmem_to_hbm [thread:$0]  (%p2667_p4), %s2587_s22, 256, %s2592_s9, %s1297_s1, %s2137_s23, %s2137_s23, %s2138_s25  }
 0x576 PF: > { %s1325_s11 = sand.u32 1, %s2112_s27   ;;  %p2668_p13 = scmp.ne.s32.totalorder %s2657_s26, 0 }
 0x577   : > { %p2669_p0 = scmp.ge.s32.totalorder %s2124_s30, 2  ;;  %s1326_s16 = scalar_lea.sflag [#allocation4], %s1325_s11 }
 0x579   : > { %p1745_p2 = pnand %p2669_p0, %p2668_p13 }
 0x57b   : > { %2107 = dma.done.wait (!%p1745_p2), %s1326_s16, 256  }
 0x57c   : > { %2109 = vsyncadd (!%p1745_p2), %s1326_s16, 4294967040  ;;  %p24_p8 = scmp.ge.s32.totalorder %s2354_s18, 4   ;;  %s2670_s27 = smov %s2116_s28 }
 0x57d   : > { %s2671_s28 = smov %s2120_s29  ;;  %s2672_s29 = smov %s2366_s24 }
 0x57e   : > { %s2673_s30 = smov %s2354_s18  ;;  %26 = sbr.rel (!%p24_p8) target bundleno = 10 (0xa), region = 117 }
 0x585   :  { %1331 = vsyncpa [#allocation3], 1 }
 0x586   :  { %1333 = vsyncpa [#allocation3 + $0x1], 1 }
 0x587   :  { %1334 = vsyncpa [#allocation6], 1 }
 0x588   :  { %1335 = vsyncpa [#allocation9], 1 }
 0x589   :  { %1336 = vsyncpa [#allocation12], 1 }
 0x58a   :  { %1337 = vsyncpa [#allocation4], 1 }
 0x58b   :  { %1339 = vsyncpa [#allocation4 + $0x1], 1 }

// kernel: tpu_custom_call.1
= control target key start
LH: loop header
LB: loop body
LE: loop exit
PB: predicated region body
PF: predicated region fallthrough
CT: control target
= control target key end

     0   :  { %s2636_s0 = inlined_call_operand.hbm [shape: bf16[2,32,128], index: 0, kind: input, shape index: {}]   ;;  %s2637_s1 = inlined_call_operand.hbm [shape: bf16[128,128], index: 1, kind: input, shape index: {}]   ;;  %s2638_s2 = inlined_call_operand.hbm [shape: bf16[128,128], index: 2, kind: input, shape index: {}]   ;;  %s2639_s3 = inlined_call_operand.hbm [shape: bf16[128,128], index: 3, kind: input, shape index: {}]   ;;  %s2640_s4 = inlined_call_operand.hbm [shape: bf16[128,128], index: 4, kind: input, shape index: {}]   ;;  %s2641_s5 = inlined_call_operand.vmem [shape: f32[1,128], index: 5, kind: input, shape index: {}]   ;;  %s2642_s6 = inlined_call_operand.vmem [shape: f32[1,128], index: 6, kind: input, shape index: {}]   ;;  %s2643_s7 = inlined_call_operand.hbm [shape: f32[128,128], index: 7, kind: input, shape index: {}]   ;;  %s2644_s8 = inlined_call_operand.hbm [shape: bf16[2,32,128], index: 8, kind: output, shape index: {}]  }
   0x1   :  { %2649 = sst [smem:[#allocation19_spill]] %s2637_s1 }
   0x2   :  { %13 = vsyncpa [#allocation3], 0 }
   0x3   :  { %15 = vsyncpa [#allocation3 + $0x1], 0 }
   0x4   :  { %16 = vsyncpa [#allocation6], 0 }
   0x5   :  { %17 = vsyncpa [#allocation9], 0 }
   0x6   :  { %18 = vsyncpa [#allocation12], 0 }
   0x7   :  { %19 = vsyncpa [#allocation4], 0 }
   0x8   :  { %21 = vsyncpa [#allocation4 + $0x1], 0  ;;  %s2184_s27 = smov 0   ;;  %s2186_s28 = smov 0  }
   0x9   :  { %s2188_s29 = smov 0   ;;  %s2190_s30 = smov 0  }
   0xa LB: > { %s2126_s9 = smov [#allocation5]   ;;  %s2205_s11 = sadd.s32 4294967295, %s2124_s30   ;;  %s2124_s30 = sphi %s2190_s30, %s2673_s30   ;;  %s2120_s29 = sphi %s2188_s29, %s2672_s29   ;;  %s2116_s28 = sphi %s2186_s28, %s2671_s28   ;;  %s2112_s27 = sphi %s2184_s27, %s2670_s27  }
   0xb   : > { %s243_s10 = sshll.u32 %s2126_s9, 4  ;;  %p1432_p0 = scmp.ge.s32.totalorder %s2124_s30, 1  ;;  %s2210_s10 = int_to_ptr.vmem [resolvable:$true] %s243_s10 }
   0xc   : > { %p2645_p1 = scmp.eq.s32.totalorder %s2205_s11, 0  ;;  %p231_p2 = scmp.lt.s32.totalorder %s2124_s30, 3 }
   0xd   : > { %s2127_s13 = smov [#allocation8]   ;;  %s2128_s16 = smov [#allocation7]  }
   0xe   : > { %p2212_p3 = pnand %p1432_p0, %p231_p2  ;;  %s269_s14 = sshll.u32 %s2127_s13, 4  ;;  %s2225_s14 = int_to_ptr.vmem [resolvable:$true] %s269_s14 }
   0xf   : > { %s256_s17 = sshll.u32 %s2128_s16, 4  ;;  %s2652_s1 = sld [smem:[#allocation19_spill]]  ;;  %s2227_s17 = int_to_ptr.vmem [resolvable:$true] %s256_s17 }
  0x10   : > { %s2650_s12 = scalar_select %p2212_p3, 1, 0 }
  0x11   : > { %p1724_p5 = pneg %p2212_p3 }
  0x13   : > { %p2221_p6 = pnand %p1724_p5, %p2645_p1 }
  0x15   : > { %s1876_s20 = scalar_lea.hbm %s2652_s1, 1024  ;;  %p2237_p8 = pneg %p2221_p6 }
  0x16   : > { %p1877_p7 = scmp.ne.s32.totalorder %s2652_s1, %s1876_s20  ;;  %p1883_p11 = scmp.lt.u32.totalorder %s1876_s20, %s2652_s1 }
  0x18   : > { %p1879_p9 = pnand %p2237_p8, %p1877_p7 }
  0x1a   : > { %p1880_p10 = pneg %p1879_p9 }
  0x1c   : > { %p1885_p12 = pnand %p1883_p11, %p1880_p10 }
  0x1e   : > { %1888 = shalt.err (!%p1885_p12)
}
  0x1f   : > { %s1889_s26 = scalar_lea.vmem %s2210_s10, 1024  ;;  %p1897_p5 = scmp.lt.s32.totalorder %s2210_s10, %s2210_s10 }
  0x20   : > { %p1890_p13 = scmp.ne.s32.totalorder %s2210_s10, %s1889_s26  ;;  %p1898_p4 = scmp.lt.s32.totalorder %s1889_s26, %s1889_s26 }
  0x22   : > { %p1892_p0 = pnand %p1890_p13, %p2237_p8  ;;  %p1899_p7 = por %p1898_p4, %p1897_p5 }
  0x24   : > { %p1893_p2 = pneg %p1892_p0 }
  0x26   : > { %p1900_p9 = pnand %p1899_p7, %p1893_p2 }
  0x28   : > { %1903 = shalt.err (!%p1900_p9)
}
  0x29   : > { %s2647_s9 = smov 64   ;;  %s2130_s13 = smov 4  }
  0x2a   : > { %1727 = dma.hbm_to_vmem [thread:$0]  (!%p2221_p6), %s2652_s1, 1024, %s2210_s10, [#allocation6], %s2647_s9, %s2647_s9, %s2130_s13  }
  0x2b   : > { %s1904_s21 = scalar_lea.hbm %s2639_s3, 1024 }
  0x2c   : > { %p1905_p4 = scmp.ne.s32.totalorder %s2639_s3, %s1904_s21  ;;  %p1911_p12 = scmp.lt.u32.totalorder %s1904_s21, %s2639_s3 }
  0x2e   : > { %p1907_p10 = pnand %p1905_p4, %p2237_p8 }
  0x30   : > { %p1908_p11 = pneg %p1907_p10 }
  0x32   : > { %p1913_p13 = pnand %p1911_p12, %p1908_p11 }
  0x34   : > { %1916 = shalt.err (!%p1913_p13)
}
  0x35   : > { %s1917_s10 = scalar_lea.vmem %s2225_s14, 1024  ;;  %p1925_p7 = scmp.lt.s32.totalorder %s2225_s14, %s2225_s14 }
  0x36   : > { %p1918_p0 = scmp.ne.s32.totalorder %s2225_s14, %s1917_s10  ;;  %p1926_p9 = scmp.lt.s32.totalorder %s1917_s10, %s1917_s10 }
  0x38   : > { %p1920_p2 = pnand %p1918_p0, %p2237_p8  ;;  %p1927_p4 = por %p1926_p9, %p1925_p7 }
  0x3a   : > { %p1921_p5 = pneg %p1920_p2 }
  0x3c   : > { %p1928_p10 = pnand %p1927_p4, %p1921_p5 }
  0x3e   : > { %1931 = shalt.err (!%p1928_p10)
}
  0x3f   : > { %1733 = dma.hbm_to_vmem [thread:$0]  (!%p2221_p6), %s2639_s3, 1024, %s2225_s14, [#allocation9], %s2647_s9, %s2647_s9, %s2130_s13  }
  0x40   : > { %s1932_s21 = scalar_lea.hbm %s2638_s2, 1024 }
  0x41   : > { %p1933_p11 = scmp.ne.s32.totalorder %s2638_s2, %s1932_s21  ;;  %p1939_p0 = scmp.lt.u32.totalorder %s1932_s21, %s2638_s2 }
  0x43   : > { %p1935_p12 = pnand %p1933_p11, %p2237_p8 }
  0x45   : > { %p1936_p13 = pneg %p1935_p12 }
  0x47   : > { %p1941_p2 = pnand %p1939_p0, %p1936_p13 }
  0x49   : > { %1944 = shalt.err (!%p1941_p2)
}
  0x4a   : > { %s1945_s14 = scalar_lea.vmem %s2227_s17, 1024  ;;  %p1953_p4 = scmp.lt.s32.totalorder %s2227_s17, %s2227_s17 }
  0x4b   : > { %p1946_p5 = scmp.ne.s32.totalorder %s2227_s17, %s1945_s14  ;;  %p1954_p10 = scmp.lt.s32.totalorder %s1945_s14, %s1945_s14 }
  0x4d   : > { %p1948_p7 = pnand %p1946_p5, %p2237_p8  ;;  %p1955_p11 = por %p1954_p10, %p1953_p4 }
  0x4f   : > { %p1949_p9 = pneg %p1948_p7 }
  0x51   : > { %p1956_p12 = pnand %p1955_p11, %p1949_p9 }
  0x53   : > { %1959 = shalt.err (!%p1956_p12)
}
  0x54   : > { %1730 = dma.hbm_to_vmem [thread:$0]  (!%p2221_p6), %s2638_s2, 1024, %s2227_s17, [#allocation6], %s2647_s9, %s2647_s9, %s2130_s13  }
  0x55   : > { %s2131_s18 = smov [#allocation10]   ;;  %s2132_s20 = smov [#allocation11]  }
  0x56   : > { %s282_s19 = sshll.u32 %s2131_s18, 4  ;;  %s301_s21 = sshll.u32 %s2132_s20, 4  ;;  %s283_s19 = int_to_ptr.vmem [resolvable:$true] %s282_s19  ;;  %s302_s21 = int_to_ptr.vmem [resolvable:$true] %s301_s21 }
  0x57   : > { %s1960_s25 = scalar_lea.hbm %s2640_s4, 1024 }
  0x58   : > { %p1961_p13 = scmp.ne.s32.totalorder %s2640_s4, %s1960_s25  ;;  %p1967_p5 = scmp.lt.u32.totalorder %s1960_s25, %s2640_s4 }
  0x5a   : > { %p1963_p0 = pnand %p1961_p13, %p2237_p8 }
  0x5c   : > { %p1964_p2 = pneg %p1963_p0 }
  0x5e   : > { %p1969_p7 = pnand %p1967_p5, %p1964_p2 }
  0x60   : > { %1972 = shalt.err (!%p1969_p7)
}
  0x61   : > { %s1973_s17 = scalar_lea.vmem %s283_s19, 1024  ;;  %p1981_p11 = scmp.lt.s32.totalorder %s283_s19, %s283_s19 }
  0x62   : > { %p1974_p9 = scmp.ne.s32.totalorder %s283_s19, %s1973_s17  ;;  %p1982_p12 = scmp.lt.s32.totalorder %s1973_s17, %s1973_s17 }
  0x64   : > { %p1976_p4 = pnand %p1974_p9, %p2237_p8  ;;  %p1983_p1 = por %p1982_p12, %p1981_p11 }
  0x66   : > { %p1977_p10 = pneg %p1976_p4 }
  0x68   : > { %p1984_p3 = pnand %p1983_p1, %p1977_p10 }
  0x6a   : > { %1987 = shalt.err (!%p1984_p3)
}
  0x6b   : > { %1736 = dma.hbm_to_vmem [thread:$0]  (!%p2221_p6), %s2640_s4, 1024, %s283_s19, [#allocation9], %s2647_s9, %s2647_s9, %s2130_s13  }
  0x6c   : > { %s1988_s22 = scalar_lea.hbm %s2643_s7, 2048 }
  0x6d   : > { %p1989_p1 = scmp.ne.s32.totalorder %s2643_s7, %s1988_s22  ;;  %p1995_p0 = scmp.lt.u32.totalorder %s1988_s22, %s2643_s7 }
  0x6f   : > { %p1991_p3 = pnand %p1989_p1, %p2237_p8 }
  0x71   : > { %p1992_p13 = pneg %p1991_p3 }
  0x73   : > { %p1997_p2 = pnand %p1995_p0, %p1992_p13 }
  0x75   : > { %2000 = shalt.err (!%p1997_p2)
}
  0x76   : > { %s2001_s10 = scalar_lea.vmem %s302_s21, 2048  ;;  %p2009_p4 = scmp.lt.s32.totalorder %s302_s21, %s302_s21 }
  0x77   : > { %p2002_p5 = scmp.ne.s32.totalorder %s302_s21, %s2001_s10  ;;  %p2010_p10 = scmp.lt.s32.totalorder %s2001_s10, %s2001_s10 }
  0x79   : > { %p2004_p7 = pnand %p2002_p5, %p2237_p8  ;;  %p2011_p11 = por %p2010_p10, %p2009_p4 }
  0x7b   : > { %p2005_p9 = pneg %p2004_p7 }
  0x7d   : > { %p2012_p12 = pnand %p2011_p11, %p2005_p9 }
  0x7f   : > { %2015 = shalt.err (!%p2012_p12)
}
  0x80   : > { %s2133_s19 = smov 128   ;;  %s2134_s23 = smov 8  }
  0x81   : > { %1739 = dma.hbm_to_vmem [thread:$0]  (!%p2221_p6), %s2643_s7, 2048, %s302_s21, [#allocation12], %s2133_s19, %s2133_s19, %s2134_s23  }
  0x82   : > { %s1431_s16 = sadd.s32 4294967294, %s2124_s30   ;;  %s2354_s18 = sadd.s32 1, %s2124_s30  }
  0x83   : > { %s34_s20 = sadd.s32 1, %s2120_s29  ;;  %s31_s22 = ssub.s32 %s2124_s30, %s2354_s18 }
  0x84   : > { %p41_p8 = scmp.ne.s32.totalorder %s2120_s29, %s2116_s28  ;;  %p32_p1 = scmp.eq.s32.totalorder %s31_s22, 0 }
  0x85   : > { %p42_p3 = scmp.eq.s32.totalorder %s2124_s30, 0  ;;  %p47_p13 = scmp.ne.s32.totalorder %s2116_s28, %s2112_s27 }
  0x86   : > { %p218_p0 = scmp.eq.s32.totalorder %s2205_s11, 1  ;;  %p2654_p5 = scmp.eq.s32.totalorder %s2205_s11, 0 }
  0x87   : > { %s2366_s24 = scalar_select %p32_p1, %s2120_s29, %s34_s20  }
  0x88   : > { %p43_p2 = por %p42_p3, %p41_p8  ;;  %p2370_p7 = por %p2654_p5, %p47_p13 }
  0x89   : > { %p2374_p6 = por %p218_p0, %p41_p8  ;;  %p224_p9 = scmp.eq.s32.totalorder %s1431_s16, 1 }
  0x8a   : > { %p1753_p4 = scmp.lt.s32.totalorder %s2124_s30, 2  ;;  %s315_s25 = sand.u32 1, %s2120_s29  }
  0x8b   : > { %s2656_s21 = scalar_select %p2374_p6, 1, 0 }
  0x8c   : > { %p2380_p10 = por %p224_p9, %p47_p13  ;;  %s1439_s14 = sshll.u32 %s315_s25, 4 }
  0x8d   : > { %s1503_s10 = sshll.u32 %s2124_s30, 8  ;;  %s319_s1 = scalar_lea.vmem [#allocation2], %s1439_s14 }
  0x8e   : > { %s2657_s26 = scalar_select %p2380_p10, 1, 0 }
  0x8f   : > { %s2388_s17 = scalar_lea.hbm %s2636_s0, %s1503_s10  ;;  %s326_s20 = sshll.u32 %s319_s1, 4  ;;  %s2394_s20 = int_to_ptr.vmem [resolvable:$true] %s326_s20 }
  0x90   : > { %p2390_p11 = pnand %p1753_p4, %p43_p2  ;;  %s2396_s22 = scalar_lea.sflag [#allocation3], %s315_s25 }
  0x91   : > { %s2016_s9 = scalar_lea.hbm %s2388_s17, 256  ;;  %s2021_s19 = scalar_lea.hbm %s2636_s0, 512 }
  0x92   : > { %p2017_p12 = scmp.ne.s32.totalorder %s2388_s17, %s2016_s9  ;;  %p2018_p8 = pneg %p2390_p11 }
  0x93   : > { %p2022_p13 = scmp.lt.u32.totalorder %s2388_s17, %s2636_s0  ;;  %p2023_p0 = scmp.lt.u32.totalorder %s2021_s19, %s2016_s9 }
  0x94   : > { %p2019_p1 = pnand %p2018_p8, %p2017_p12  ;;  %p2025_p5 = scmp.lt.u32.totalorder %s2016_s9, %s2388_s17 }
  0x95   : > { %p2024_p2 = por %p2023_p0, %p2022_p13 }
  0x96   : > { %p2020_p3 = pneg %p2019_p1 }
  0x97   : > { %p2026_p9 = por %p2025_p5, %p2024_p2 }
  0x99   : > { %p2027_p4 = pnand %p2026_p9, %p2020_p3 }
  0x9b   : > { %2030 = shalt.err (!%p2027_p4)
}
  0x9c   : > { %s2031_s25 = scalar_lea.vmem %s2394_s20, 256  ;;  %s2135_s14 = smov [#allocation2]  }
  0x9d   : > { %p2032_p12 = scmp.ne.s32.totalorder %s2394_s20, %s2031_s25  ;;  %s2036_s10 = sshll.u32 %s2135_s14, 4  ;;  %s2037_s10 = int_to_ptr.vmem [resolvable:$false] %s2036_s10 }
  0x9e   : > { %s2038_s23 = scalar_lea.vmem %s2037_s10, 512  ;;  %p2039_p6 = scmp.lt.s32.totalorder %s2394_s20, %s2037_s10 }
  0x9f   : > { %p2034_p1 = pnand %p2032_p12, %p2018_p8  ;;  %p2040_p13 = scmp.lt.s32.totalorder %s2038_s23, %s2031_s25 }
  0xa1   : > { %p2035_p10 = pneg %p2034_p1  ;;  %p2041_p0 = por %p2040_p13, %p2039_p6 }
  0xa3   : > { %p2042_p2 = pnand %p2041_p0, %p2035_p10 }
  0xa5   : > { %2045 = shalt.err (!%p2042_p2)
}
  0xa6   : > { %s2659_s9 = smov 64   ;;  %p2660_p8 = scmp.ne.s32.totalorder %s2650_s12, 0 }
  0xa7   : > { %1743 = dma.hbm_to_vmem [thread:$0]  (!%p2390_p11), %s2388_s17, 256, %s2394_s20, %s2396_s22, %s2659_s9, %s2659_s9, %s2130_s13  }
  0xa8   : > { %338 = sbr.rel (%p2660_p8) target bundleno = 1398 (0x576), region = 52  ;;  %s2430_s19 = sand.u32 (!%p2660_p8), 1, %s2116_s28  }
  0xa9   : > { %s1443_s1 = sshll.u32 (!%p2660_p8), %s2430_s19, 4  ;;  %s341_s25 = scalar_lea.sflag (!%p2660_p8), [#allocation3], %s2430_s19 }
  0xaa   : > { %s2436_s16 = scalar_lea.vmem (!%p2660_p8), [#allocation2], %s1443_s1 }
  0xaf   : > { %2091 = dma.done.wait (%p2370_p7), %s341_s25, 256  }
  0xb0   : > { %2093 = vsyncadd (%p2370_p7), %s341_s25, 4294967040  ;;  %p2661_p6 = scmp.eq.s32.totalorder %s2205_s11, 0 }
  0xb2   : > { %2095 = dma.done.wait (%p2661_p6), [#allocation6], 2048   ;;  %p2662_p10 = pmov %p2661_p6 }
  0xb3   : > { %p2663_p11 = pmov %p2661_p6 }
  0xb4   : > { %2097 = vsyncadd (%p2662_p10), [#allocation6], 4294965248 }
  0xb5   : > { %2099 = dma.done.wait (%p2663_p11), [#allocation9], 2048   ;;  %p2664_p3 = pmov %p2661_p6 }
  0xb7   : > { %2101 = vsyncadd (%p2664_p3), [#allocation9], 4294965248  ;;  %p2665_p5 = pmov %p2664_p3 }
  0xb8   : > { %p2666_p9 = pmov %p2664_p3 }
  0xb9   : > { %2103 = dma.done.wait (%p2665_p5), [#allocation12], 2048  }
  0xba   : > { %2105 = vsyncadd (%p2666_p9), [#allocation12], 4294965248  ;;  %v1804_v0 = vld [vmem:[#allocation7] sm:$0xff]   ;;  %v1805_v1 = vld [vmem:[#allocation7 + $0x8] sm:$0xff]   ;;  %vm698_vm0 = vcmask 261120   ;;  %s396_s20 = scalar_lea.vmem [#allocation13], %s1443_s1 }
  0xbb   : > { %1600 = vmatprep.subr.bf16.mxu1 %v1804_v0  ;;  %v1806_v2 = vld [vmem:[#allocation7 + $0x10] sm:$0xff]   ;;  %v1807_v3 = vld [vmem:[#allocation7 + $0x18] sm:$0xff]   ;;  %v1814_v5 = vld [vmem:[#allocation5] sm:$0xff]   ;;  %s1310_s22 = sshll.u32 %s396_s20, 4  ;;  %s1508_s14 = sshll.u32 %s2205_s11, 8  ;;  %s2587_s22 = int_to_ptr.vmem [resolvable:$true] %s1310_s22 }
  0xbc   : > { %1601 = vmatpush3.bf16.msra.mxu1 %v1804_v0  ;;  %v1812_v4 = vld [vmem:[%s2436_s16] sm:$0xff]   ;;  %v1815_v6 = vld [vmem:[#allocation5 + $0x8] sm:$0xff]   ;;  %1580 = vmatprep.subr.bf16.mxu0 %v1814_v5  ;;  %v1817_v10 = vld [vmem:[#allocation5 + $0x18] sm:$0xff]   ;;  %s2592_s9 = scalar_lea.hbm %s2644_s8, %s1508_s14  ;;  %s1297_s1 = scalar_lea.sflag [#allocation4], %s2430_s19 }
  0xbd   : > { %1602 = vmatprep.subr.bf16.mxu1 %v1805_v1  ;;  %1616 = vmatprep.mubr.bf16.mxu1 %v1812_v4  ;;  %v1808_v7 = vld [vmem:[#allocation7 + $0x20] sm:$0xff]   ;;  %v1816_v8 = vld [vmem:[#allocation5 + $0x10] sm:$0xff]   ;;  %v1809_v9 = vld [vmem:[#allocation7 + $0x28] sm:$0xff]   ;;  %s2046_s25 = scalar_lea.vmem %s2587_s22, 256  ;;  %p2667_p4 = scmp.ne.s32.totalorder %s2656_s21, 0 }
  0xbe   : > { %1596 = vmatprep.mubr.bf16.mxu0 %v1812_v4  ;;  %1581 = vmatpush3.bf16.msra.mxu0 %v1814_v5  ;;  %v1810_v11 = vld [vmem:[#allocation7 + $0x30] sm:$0xff]   ;;  %v1818_v12 = vld [vmem:[#allocation5 + $0x20] sm:$0xff]   ;;  %v1811_v13 = vld [vmem:[#allocation7 + $0x38] sm:$0xff]   ;;  %p2047_p7 = scmp.ne.s32.totalorder %s2587_s22, %s2046_s25  ;;  %s2136_s11 = smov [#allocation13]  }
  0xbf   : > { %1582 = vmatprep.subr.bf16.mxu0 %v1815_v6  ;;  %v1819_v14 = vld [vmem:[#allocation5 + $0x28] sm:$0xff]   ;;  %v1820_v16 = vld [vmem:[#allocation5 + $0x30] sm:$0xff]   ;;  %v1821_v17 = vld [vmem:[#allocation5 + $0x38] sm:$0xff]  }
  0xc0   : > { %1603 = vmatpush3.bf16.msra.mxu1 %v1805_v1  ;;  %v2456_v15 = vld [vmem:[%s2436_s16 + $0x8] sm:$0xff]   ;;  %v1822_v61 = vld [vmem:[#allocation8] sm:$0xff]   ;;  %p2048_p12 = pnand %p2047_p7, %p2667_p4  ;;  %s2050_s16 = sshll.u32 %s2136_s11, 4  ;;  %s2051_s16 = int_to_ptr.vmem [resolvable:$false] %s2050_s16 }
  0xc1   : > { %1604 = vmatprep.subr.bf16.mxu1 %v1806_v2  ;;  %v1823_v62 = vld [vmem:[#allocation8 + $0x8] sm:$0xff]   ;;  %s2052_s12 = scalar_lea.vmem %s2051_s16, 512  ;;  %p2053_p13 = scmp.lt.s32.totalorder %s2587_s22, %s2051_s16 }
  0xc2   : > { %1583 = vmatpush3.bf16.msra.mxu0 %v1815_v6  ;;  %p2049_p1 = pneg %p2048_p12  ;;  %p2054_p0 = scmp.lt.s32.totalorder %s2052_s12, %s2046_s25 }
  0xc3   : > { %1584 = vmatprep.subr.bf16.mxu0 %v1816_v8 }
  0xc4   : > { %1605 = vmatpush3.bf16.msra.mxu1 %v1806_v2  ;;  %p2055_p2 = por %p2054_p0, %p2053_p13 }
  0xc5   : > { %1606 = vmatprep.subr.bf16.mxu1 %v1807_v3 }
  0xc6   : > { %1585 = vmatpush3.bf16.msra.mxu0 %v1816_v8  ;;  %v1826_v8 = vld [vmem:[#allocation8 + $0x20] sm:$0xff]   ;;  %p2056_p8 = pnand %p2055_p2, %p2049_p1 }
  0xc7   : > { %1586 = vmatprep.subr.bf16.mxu0 %v1817_v10 }
  0xc8   : > { %1607 = vmatpush3.bf16.msra.mxu1 %v1807_v3 }
  0xc9   : > { %1608 = vmatprep.subr.bf16.mxu1 %v1808_v7 }
  0xca   : > { %1587 = vmatpush3.bf16.msra.mxu0 %v1817_v10  ;;  %v1828_v10 = vld [vmem:[#allocation8 + $0x30] sm:$0xff]  }
  0xcb   : > { %1588 = vmatprep.subr.bf16.mxu0 %v1818_v12 }
  0xcc   : > { %1609 = vmatpush3.bf16.msra.mxu1 %v1808_v7  ;;  %v1825_v7 = vld [vmem:[#allocation8 + $0x18] sm:$0xff]  }
  0xcd   : > { %1610 = vmatprep.subr.bf16.mxu1 %v1809_v9 }
  0xce   : > { %1589 = vmatpush3.bf16.msra.mxu0 %v1818_v12 }
  0xcf   : > { %1590 = vmatprep.subr.bf16.mxu0 %v1819_v14 }
  0xd0   : > { %1611 = vmatpush3.bf16.msra.mxu1 %v1809_v9  ;;  %v1827_v9 = vld [vmem:[#allocation8 + $0x28] sm:$0xff]  }
  0xd1   : > { %1612 = vmatprep.subr.bf16.mxu1 %v1810_v11 }
  0xd2   : > { %1591 = vmatpush3.bf16.msra.mxu0 %v1819_v14 }
  0xd3   : > { %1592 = vmatprep.subr.bf16.mxu0 %v1820_v16 }
  0xd4   : > { %1613 = vmatpush3.bf16.msra.mxu1 %v1810_v11  ;;  %v1829_v11 = vld [vmem:[#allocation8 + $0x38] sm:$0xff]  }
  0xd5   : > { %1614 = vmatprep.subr.bf16.mxu1 %v1811_v13 }
  0xd6   : > { %1593 = vmatpush3.bf16.msra.mxu0 %v1820_v16 }
  0xd7   : > { %1594 = vmatprep.subr.bf16.mxu0 %v1821_v17 }
  0xd8   : > { %1615 = vmatpush3.bf16.msra.mxu1 %v1811_v13 }
  0xd9   : > { %1640 = vmatprep.subr.bf16.mxu1 %v1822_v61 }
  0xda   : > { %1595 = vmatpush3.bf16.msra.mxu0 %v1821_v17 }
  0xdb   : > { %1617 = vmatmul.mubr.bf16.vlgmr.msra.gmra.mrb[0].mxu1 %v2456_v15 }
  0xdc   : > { %1656 = vmatprep.mubr.bf16.mxu1 %v1812_v4  ;;  %1641 = vmatpush3.bf16.msra.mxu1 %v1822_v61  ;;  %v1824_v4 = vld [vmem:[#allocation8 + $0x10] sm:$0xff]   ;;  %v851_v61 = vld [vmem:[#allocation11 + $0x40] sm:$0xff] }
  0xdd   : > { %1597 = vmatmul.mubr.bf16.vlgmr.msra.gmra.mrb[0].mxu0 %v2456_v15  ;;  %1642 = vmatprep.subr.bf16.mxu1 %v1823_v62 }
  0xe0   : > { %1643 = vmatpush3.bf16.msra.mxu1 %v1823_v62 }
  0xe1   : > { %1644 = vmatprep.subr.bf16.mxu1 %v1824_v4 }
  0xe4   : > { %1645 = vmatpush3.bf16.msra.mxu1 %v1824_v4  ;;  %v852_v4 = vld [vmem:[#allocation11 + $0x48] sm:$0xff] }
  0xe5   : > { %1646 = vmatprep.subr.bf16.mxu1 %v1825_v7 }
  0xe8   : > { %1647 = vmatpush3.bf16.msra.mxu1 %v1825_v7 }
  0xe9   : > { %1648 = vmatprep.subr.bf16.mxu1 %v1826_v8 }
  0xec   : > { %1649 = vmatpush3.bf16.msra.mxu1 %v1826_v8 }
  0xed   : > { %1650 = vmatprep.subr.bf16.mxu1 %v1827_v9 }
  0xf0   : > { %1651 = vmatpush3.bf16.msra.mxu1 %v1827_v9 }
  0xf1   : > { %1652 = vmatprep.subr.bf16.mxu1 %v1828_v10 }
  0xf4   : > { %1653 = vmatpush3.bf16.msra.mxu1 %v1828_v10 }
  0xf5   : > { %1654 = vmatprep.subr.bf16.mxu1 %v1829_v11 }
  0xf8   : > { %1655 = vmatpush3.bf16.msra.mxu1 %v1829_v11 }
  0xfb   : > { %1657 = vmatmul.mubr.bf16.vlgmr.msra.gmra.mrb[4].mxu1 %v2456_v15 }
 0x1ae   : > { %v1618_v18 = vpop.f32.mrb[0].mxu1 }
 0x1af   : > { %v625_v19 = vpop.f32.mrb[1].mxu1  ;;  %v657_v24 = vmul.f32 %v1618_v18, %v1618_v18 }
 0x1b0   : > { %v1619_v20 = vpop.f32.mrb[2].mxu1  ;;  %v655_v22 = vmul.f32 %v625_v19, %v625_v19  ;;  %v1598_v29 = vpop.f32.mrb[0].mxu0 }
 0x1b1   : > { %v628_v21 = vpop.f32.mrb[3].mxu1  ;;  %v658_v26 = vmul.f32 %v1619_v20, %v1619_v20  ;;  %v512_v30 = vpop.f32.mrb[1].mxu0  ;;  %v642_v36 = vmul.f32 %v1598_v29, %v1598_v29 }
 0x1b2   : > { %v656_v23 = vmul.f32 %v628_v21, %v628_v21  ;;  %v640_v32 = vmul.f32 %v512_v30, %v512_v30  ;;  %v1599_v33 = vpop.f32.mrb[2].mxu0 }
 0x1b3   : > { %v515_v34 = vpop.f32.mrb[3].mxu0  ;;  %v643_v39 = vmul.f32 %v1599_v33, %v1599_v33 }
 0x1b4   : > { %v659_v25 = vadd.f32 %v656_v23, %v655_v22  ;;  %v641_v37 = vmul.f32 %v515_v34, %v515_v34 }
 0x1b6   : > { %v660_v27 = vadd.f32 %v659_v25, %v657_v24  ;;  %v644_v40 = vadd.f32 %v641_v37, %v640_v32  ;;  %v2472_v24 = vld [vmem:[%s2642_s6] ss:$0 sm:$0xff] }
 0x1b8   : > { %v661_v28 = vadd.f32 %v660_v27, %v658_v26  ;;  %v645_v42 = vadd.f32 %v644_v40, %v642_v36  ;;  %v845_v26 = vld [vmem:[#allocation11 + $0x10] sm:$0xff] }
 0x1ba   : > { %v662_v31 = vrot.slane %v661_v28, 4  ;;  %v646_v44 = vadd.f32 %v645_v42, %v643_v39  ;;  %v850_v39 = vld [vmem:[#allocation11 + $0x38] sm:$0xff] }
 0x1bc   : > { %v663_v35 = vadd.f32 %v662_v31, %v661_v28  ;;  %v647_v46 = vrot.slane %v646_v44, 4 }
 0x1be   : > { %v664_v38 = vrot.slane %v663_v35, 2  ;;  %v648_v48 = vadd.f32 %v647_v46, %v646_v44 }
 0x1c0   : > { %v665_v41 = vadd.f32 %v664_v38, %v663_v35  ;;  %v649_v49 = vrot.slane %v648_v48, 2  ;;  %v846_v35 = vld [vmem:[#allocation11 + $0x18] sm:$0xff] }
 0x1c2   : > { %v666_v43 = vrot.slane %v665_v41, 1  ;;  %v650_v50 = vadd.f32 %v649_v49, %v648_v48 }
 0x1c4   : > { %v667_v45 = vadd.f32 %v666_v43, %v665_v41  ;;  %v651_v51 = vrot.slane %v650_v50, 1  ;;  %v844_v41 = vld [vmem:[#allocation11 + $0x8] sm:$0xff] }
 0x1c6   : > { %v668_v47 = vmax.f32 %v667_v45, 1e-24  ;;  %v652_v52 = vadd.f32 %v651_v51, %v650_v50  ;;  %v848_v45 = vld [vmem:[#allocation11 + $0x28] sm:$0xff] }
 0x1c8   : > { %1838 = vrsqrt.f32 %v668_v47  ;;  %v653_v53 = vmax.f32 %v652_v52, 1e-24 }
 0x1ca   : > { %1840 = vrsqrt.f32 %v653_v53 }
 0x1d2   : > { %v1839_v54 = vpop.eup %1838 }
 0x1d3   : > { %v677_v55 = vmul.f32 %v1839_v54, %v628_v21  ;;  %v676_v56 = vmul.f32 %v1839_v54, %v625_v19  ;;  %v678_v57 = vmul.f32 %v1839_v54, %v1618_v18  ;;  %v679_v58 = vmul.f32 %v1839_v54, %v1619_v20 }
 0x1d4   : > { %v1841_v63 = vpop.eup %1840 }
 0x1d5   : > { %v680_v59 = vpack.c.bf16 %v677_v55, %v676_v56  ;;  %v681_v60 = vpack.c.bf16 %v679_v58, %v678_v57  ;;  %v670_v0 = vmul.f32 %v1841_v63, %v512_v30  ;;  %v671_v1 = vmul.f32 %v1841_v63, %v515_v34  ;;  %v843_v30 = vld [vmem:[#allocation11] sm:$0xff]  ;;  %v853_v58 = vld [vmem:[#allocation11 + $0x50] sm:$0xff] }
 0x1d6   : > { %v672_v2 = vmul.f32 %v1841_v63, %v1598_v29  ;;  %v673_v3 = vmul.f32 %v1841_v63, %v1599_v33  ;;  %v849_v29 = vld [vmem:[#allocation11 + $0x30] sm:$0xff]  ;;  %v847_v34 = vld [vmem:[#allocation11 + $0x20] sm:$0xff] }
 0x1d7   : > { %682 = vxpose.xlu0.c.b16.start [1/2] (short) %v680_v59, 128  ;;  %v674_v5 = vpack.c.bf16 %v671_v1, %v670_v0  ;;  %v854_v0 = vld [vmem:[#allocation11 + $0x58] sm:$0xff] }
 0x1d8   : > { %v675_v6 = vpack.c.bf16 %v673_v3, %v672_v2 }
 0x1d9   : > { %1620 = vmatprep.subr.bf16.mxu0 %v674_v5 }
 0x1da   : > { %1621 = vmatpush3.bf16.msra.mxu0 %v674_v5  ;;  %v2511_v5 = vpop.f32.mrb[4].mxu1 }
 0x1db   : > { %683 = vxpose.xlu0.c.b16.end [2/2] (short) %v681_v60, 128  ;;  %1622 = vmatprep.subr.bf16.mxu0 %v675_v6  ;;  %v1088_v8 = vpop.f32.mrb[5].mxu1 }
 0x1dc   : > { %v2519_v11 = vpop.f32.mrb[6].mxu1 }
 0x1de   : > { %1623 = vmatpush3.bf16.msra.mxu0 %v675_v6 }
 0x23d   : > { %v690_v12 = vpop.trf.xlu0 }
 0x23e   : > { %1624 = vmatprep.mubr.msk.bf16.mxu0 %vm698_vm0, %v690_v12 }
 0x241   : > { %v691_v13 = vpop.trf.xlu0 }
 0x242   : > { %1625 = vmatmul.mubr.msk.bf16.vlgmr.msra.gmra.mrb[4].mxu0 %vm698_vm0, %v691_v13 }
 0x245   : > { %v692_v14 = vpop.trf.xlu0 }
 0x246   : > { %1628 = vmatprep.mubr.msk.bf16.mxu0 %vm698_vm0, %v692_v14  ;;  %v1104_v14 = vpack.c.bf16 %v2519_v11, %v2511_v5 }
 0x249   : > { %v693_v16 = vpop.trf.xlu0 }
 0x24a   : > { %1629 = vmatmul.mubr.msk.bf16.gmra.mrb[8].mxu0 %vm698_vm0, %v693_v16  ;;  %v1091_v16 = vpop.f32.mrb[7].mxu1 }
 0x24d   : > { %v694_v17 = vpop.trf.xlu0 }
 0x24e   : > { %1632 = vmatprep.mubr.msk.bf16.mxu0 %vm698_vm0, %v694_v17 }
 0x251   : > { %v695_v18 = vpop.trf.xlu0 }
 0x252   : > { %1633 = vmatmul.mubr.msk.bf16.gmra.mrb[12].mxu0 %vm698_vm0, %v695_v18  ;;  %v1103_v18 = vpack.c.bf16 %v1091_v16, %v1088_v8 }
 0x255   : > { %v696_v15 = vpop.trf.xlu0 }
 0x256   : > { %1636 = vmatprep.mubr.msk.bf16.mxu0 %vm698_vm0, %v696_v15 }
 0x259   : > { %v697_v19 = vpop.trf.xlu0 }
 0x25a   : > { %1637 = vmatmul.mubr.msk.bf16.gmra.mrb[16].mxu0 %vm698_vm0, %v697_v19 }
 0x25b   : > { %1676 = vmatprep.mubr.bf16.mxu0 %v1103_v18 }
 0x315   : > { %v1626_v20 = vpop.f32.mrb[4].mxu0 }
 0x316   : > { %v757_v21 = vpop.f32.mrb[5].mxu0  ;;  %v829_v25 = vmul.f32 %v1626_v20, %v2472_v24  ;;  %v857_v20 = vld [vmem:[#allocation11 + $0x70] sm:$0xff] }
 0x317   : > { %v1627_v22 = vpop.f32.mrb[6].mxu0  ;;  %v827_v27 = vmul.f32 %v2472_v24, %v757_v21 }
 0x318   : > { %v760_v23 = vpop.f32.mrb[7].mxu0  ;;  %v830_v31 = vmul.f32 %v1627_v22, %v2472_v24  ;;  %v2480_v40 = vadd.f32 %v845_v26, %v829_v25 }
 0x319   : > { %v828_v36 = vmul.f32 %v2472_v24, %v760_v23  ;;  %v2485_v46 = vadd.f32 %v843_v30, %v827_v27  ;;  %v855_v23 = vld [vmem:[#allocation11 + $0x60] sm:$0xff]  ;;  %v858_v27 = vld [vmem:[#allocation11 + $0x78] sm:$0xff] }
 0x31a   : > { %v2490_v49 = vadd.f32 %v846_v35, %v830_v31  ;;  %v856_v31 = vld [vmem:[#allocation11 + $0x68] sm:$0xff] }
 0x31b   : > { %v2496_v52 = vadd.f32 %v844_v41, %v828_v36  ;;  %v1830_v36 = vld [vmem:[#allocation10] sm:$0xff]  }
 0x31c   : > { %1680 = vmatprep.subr.bf16.mxu1 %v1830_v36 }
 0x31d   : > { %v1630_v28 = vpop.f32.mrb[8].mxu0  ;;  %1681 = vmatpush3.bf16.msra.mxu1 %v1830_v36 }
 0x31e   : > { %v833_v32 = vmul.f32 %v1630_v28, %v2472_v24  ;;  %v773_v33 = vpop.f32.mrb[9].mxu0 }
 0x31f   : > { %v831_v37 = vmul.f32 %v2472_v24, %v773_v33  ;;  %v1631_v38 = vpop.f32.mrb[10].mxu0 }
 0x320   : > { %v2482_v42 = vadd.f32 %v849_v29, %v833_v32  ;;  %v834_v43 = vmul.f32 %v1631_v38, %v2472_v24  ;;  %v776_v44 = vpop.f32.mrb[11].mxu0 }
 0x321   : > { %v2487_v47 = vadd.f32 %v847_v34, %v831_v37  ;;  %v832_v48 = vmul.f32 %v2472_v24, %v776_v44  ;;  %v1831_v37 = vld [vmem:[#allocation10 + $0x8] sm:$0xff]  }
 0x322   : > { %v877_v50 = vmax.f32 %v2480_v40, %v2482_v42  ;;  %v2494_v51 = vadd.f32 %v850_v39, %v834_v43  ;;  %1682 = vmatprep.subr.bf16.mxu1 %v1831_v37 }
 0x323   : > { %v875_v53 = vmax.f32 %v2485_v46, %v2487_v47  ;;  %v2500_v54 = vadd.f32 %v848_v45, %v832_v48  ;;  %v1832_v45 = vld [vmem:[#allocation10 + $0x10] sm:$0xff]   ;;  %1683 = vmatpush3.bf16.msra.mxu1 %v1831_v37 }
 0x324   : > { %v878_v55 = vmax.f32 %v2490_v49, %v2494_v51  ;;  %1684 = vmatprep.subr.bf16.mxu1 %v1832_v45 }
 0x325   : > { %v876_v56 = vmax.f32 %v2496_v52, %v2500_v54  ;;  %v1634_v57 = vpop.f32.mrb[12].mxu0 }
 0x326   : > { %v837_v59 = vmul.f32 %v1634_v57, %v2472_v24  ;;  %v789_v60 = vpop.f32.mrb[13].mxu0 }
 0x327   : > { %v835_v62 = vmul.f32 %v2472_v24, %v789_v60  ;;  %v1635_v63 = vpop.f32.mrb[14].mxu0  ;;  %1685 = vmatpush3.bf16.msra.mxu1 %v1832_v45 }
 0x328   : > { %v2508_v1 = vadd.f32 %v853_v58, %v837_v59  ;;  %v838_v2 = vmul.f32 %v1635_v63, %v2472_v24  ;;  %v792_v3 = vpop.f32.mrb[15].mxu0  ;;  %v1835_v59 = vld [vmem:[#allocation10 + $0x28] sm:$0xff]  }
 0x329   : > { %v2513_v6 = vadd.f32 %v851_v61, %v835_v62  ;;  %v836_v7 = vmul.f32 %v2472_v24, %v792_v3  ;;  %v1836_v62 = vld [vmem:[#allocation10 + $0x30] sm:$0xff]  }
 0x32a   : > { %v881_v9 = vmax.f32 %v877_v50, %v2508_v1  ;;  %v2517_v10 = vadd.f32 %v854_v0, %v838_v2  ;;  %v1833_v50 = vld [vmem:[#allocation10 + $0x18] sm:$0xff]  }
 0x32b   : > { %v879_v12 = vmax.f32 %v875_v53, %v2513_v6  ;;  %v2522_v13 = vadd.f32 %v852_v4, %v836_v7  ;;  %1686 = vmatprep.subr.bf16.mxu1 %v1833_v50 }
 0x32c   : > { %v882_v17 = vmax.f32 %v878_v55, %v2517_v10  ;;  %1687 = vmatpush3.bf16.msra.mxu1 %v1833_v50 }
 0x32d   : > { %v880_v15 = vmax.f32 %v876_v56, %v2522_v13  ;;  %v1638_v19 = vpop.f32.mrb[16].mxu0  ;;  %v1834_v56 = vld [vmem:[#allocation10 + $0x20] sm:$0xff]  }
 0x32e   : > { %v841_v21 = vmul.f32 %v1638_v19, %v2472_v24  ;;  %v805_v22 = vpop.f32.mrb[17].mxu0  ;;  %1688 = vmatprep.subr.bf16.mxu1 %v1834_v56 }
 0x32f   : > { %v839_v25 = vmul.f32 %v2472_v24, %v805_v22  ;;  %v1639_v26 = vpop.f32.mrb[18].mxu0 }
 0x330   : > { %v2530_v28 = vadd.f32 %v857_v20, %v841_v21  ;;  %v842_v29 = vmul.f32 %v1639_v26, %v2472_v24  ;;  %v808_v30 = vpop.f32.mrb[19].mxu0  ;;  %1689 = vmatpush3.bf16.msra.mxu1 %v1834_v56 }
 0x331   : > { %v2533_v32 = vadd.f32 %v855_v23, %v839_v25  ;;  %v840_v33 = vmul.f32 %v2472_v24, %v808_v30  ;;  %1690 = vmatprep.subr.bf16.mxu1 %v1835_v59 }
 0x332   : > { %v885_v34 = vmax.f32 %v881_v9, %v2530_v28  ;;  %v2537_v35 = vadd.f32 %v858_v27, %v842_v29 }
 0x333   : > { %v883_v38 = vmax.f32 %v879_v12, %v2533_v32  ;;  %v2540_v39 = vadd.f32 %v856_v31, %v840_v33 }
 0x334   : > { %v886_v41 = vmax.f32 %v882_v17, %v2537_v35  ;;  %1691 = vmatpush3.bf16.msra.mxu1 %v1835_v59 }
 0x335   : > { %v884_v43 = vmax.f32 %v880_v15, %v2540_v39  ;;  %1692 = vmatprep.subr.bf16.mxu1 %v1836_v62 }
 0x336   : > { %v888_v44 = vmax.f32 %v885_v34, %v886_v41 }
 0x337   : > { %v887_v24 = vmax.f32 %v883_v38, %v884_v43 }
 0x338   : > { %1693 = vmatpush3.bf16.msra.mxu1 %v1836_v62 }
 0x339   : > { %v889_v48 = vmax.f32 %v887_v24, %v888_v44 }
 0x33b   : > { %v890_v53 = vrot.slane %v889_v48, 4 }
 0x33d   : > { %v891_v55 = vmax.f32 %v889_v48, %v890_v53 }
 0x33f   : > { %v892_v57 = vrot.slane %v891_v55, 2 }
 0x341   : > { %v893_v58 = vmax.f32 %v891_v55, %v892_v57 }
 0x343   : > { %v894_v60 = vrot.slane %v893_v58, 1 }
 0x345   : > { %v2544_v61 = vmax.f32 %v893_v58, %v894_v60 }
 0x347   : > { %v896_v63 = vsub.f32 %v2485_v46, %v2544_v61  ;;  %v897_v0 = vsub.f32 %v2496_v52, %v2544_v61  ;;  %v898_v2 = vsub.f32 %v2480_v40, %v2544_v61  ;;  %v899_v3 = vsub.f32 %v2490_v49, %v2544_v61 }
 0x348   : > { %v900_v4 = vsub.f32 %v2487_v47, %v2544_v61  ;;  %v901_v7 = vsub.f32 %v2500_v54, %v2544_v61  ;;  %v902_v8 = vsub.f32 %v2482_v42, %v2544_v61  ;;  %v903_v46 = vsub.f32 %v2494_v51, %v2544_v61 }
 0x349   : > { %v904_v52 = vsub.f32 %v2513_v6, %v2544_v61  ;;  %v905_v40 = vsub.f32 %v2522_v13, %v2544_v61  ;;  %v906_v49 = vsub.f32 %v2508_v1, %v2544_v61  ;;  %v907_v47 = vsub.f32 %v2517_v10, %v2544_v61 }
 0x34a   : > { %v908_v54 = vsub.f32 %v2533_v32, %v2544_v61  ;;  %v909_v42 = vsub.f32 %v2540_v39, %v2544_v61  ;;  %v910_v51 = vsub.f32 %v2530_v28, %v2544_v61  ;;  %v911_v6 = vsub.f32 %v2537_v35, %v2544_v61 }
 0x34b   : > { %v912_v9 = vmul.f32 1.442695, %v896_v63  ;;  %v914_v12 = vmul.f32 1.442695, %v897_v0  ;;  %v916_v1 = vmul.f32 1.442695, %v898_v2 }
 0x34c   : > { %v918_v10 = vmul.f32 1.442695, %v899_v3  ;;  %v920_v13 = vmul.f32 1.442695, %v900_v4  ;;  %v922_v16 = vmul.f32 1.442695, %v901_v7 }
 0x34d   : > { %1842 = vpow2.f32 %v912_v9  ;;  %v924_v17 = vmul.f32 1.442695, %v902_v8  ;;  %v926_v18 = vmul.f32 1.442695, %v903_v46  ;;  %v928_v20 = vmul.f32 1.442695, %v904_v52 }
 0x34e   : > { %1844 = vpow2.f32 %v914_v12  ;;  %v930_v23 = vmul.f32 1.442695, %v905_v40  ;;  %v932_v27 = vmul.f32 1.442695, %v906_v49  ;;  %v934_v30 = vmul.f32 1.442695, %v907_v47 }
 0x34f   : > { %1846 = vpow2.f32 %v916_v1  ;;  %v936_v33 = vmul.f32 1.442695, %v908_v54  ;;  %v938_v36 = vmul.f32 1.442695, %v909_v42  ;;  %v940_v39 = vmul.f32 1.442695, %v910_v51 }
 0x350   : > { %1848 = vpow2.f32 %v918_v10  ;;  %v942_v44 = vmul.f32 1.442695, %v911_v6 }
 0x351   : > { %1850 = vpow2.f32 %v920_v13 }
 0x352   : > { %1852 = vpow2.f32 %v922_v16 }
 0x353   : > { %1854 = vpow2.f32 %v924_v17 }
 0x354   : > { %1856 = vpow2.f32 %v926_v18 }
 0x355   : > { %1858 = vpow2.f32 %v928_v20 }
 0x356   : > { %1860 = vpow2.f32 %v930_v23 }
 0x357   : > { %v1843_v15 = vpop.eup %1842  ;;  %1862 = vpow2.f32 %v932_v27 }
 0x358   : > { %v1845_v19 = vpop.eup %1844  ;;  %1864 = vpow2.f32 %v934_v30 }
 0x359   : > { %v944_v21 = vadd.f32 %v1845_v19, %v1843_v15  ;;  %v1847_v22 = vpop.eup %1846  ;;  %1866 = vpow2.f32 %v936_v33 }
 0x35a   : > { %v1849_v26 = vpop.eup %1848  ;;  %1868 = vpow2.f32 %v938_v36  ;;  %v1485_v36 = vld [vmem:[%s2641_s5] ss:$0 sm:$0xff] }
 0x35b   : > { %v945_v25 = vadd.f32 %v1847_v22, %v944_v21  ;;  %v1851_v29 = vpop.eup %1850  ;;  %1870 = vpow2.f32 %v940_v39 }
 0x35c   : > { %v1853_v32 = vpop.eup %1852  ;;  %1872 = vpow2.f32 %v942_v44 }
 0x35d   : > { %v946_v28 = vadd.f32 %v1849_v26, %v945_v25  ;;  %v1855_v35 = vpop.eup %1854 }
 0x35e   : > { %v1857_v38 = vpop.eup %1856 }
 0x35f   : > { %v947_v31 = vadd.f32 %v1851_v29, %v946_v28  ;;  %v1859_v43 = vpop.eup %1858  ;;  %v1837_v28 = vld [vmem:[#allocation10 + $0x38] sm:$0xff]  }
 0x360   : > { %v1861_v24 = vpop.eup %1860  ;;  %1694 = vmatprep.subr.bf16.mxu1 %v1837_v28 }
 0x361   : > { %v948_v34 = vadd.f32 %v1853_v32, %v947_v31  ;;  %v1863_v50 = vpop.eup %1862  ;;  %1695 = vmatpush3.bf16.msra.mxu1 %v1837_v28 }
 0x362   : > { %v1865_v55 = vpop.eup %1864 }
 0x363   : > { %v949_v37 = vadd.f32 %v1855_v35, %v948_v34  ;;  %v1867_v57 = vpop.eup %1866 }
 0x364   : > { %v1869_v59 = vpop.eup %1868 }
 0x365   : > { %v950_v41 = vadd.f32 %v1857_v38, %v949_v37  ;;  %v1871_v61 = vpop.eup %1870 }
 0x366   : > { %v1873_v63 = vpop.eup %1872 }
 0x367   : > { %v951_v45 = vadd.f32 %v1859_v43, %v950_v41 }
 0x369   : > { %v952_v48 = vadd.f32 %v1861_v24, %v951_v45 }
 0x36b   : > { %v953_v53 = vadd.f32 %v1863_v50, %v952_v48 }
 0x36d   : > { %v954_v56 = vadd.f32 %v1865_v55, %v953_v53 }
 0x36f   : > { %v955_v58 = vadd.f32 %v1867_v57, %v954_v56 }
 0x371   : > { %v956_v60 = vadd.f32 %v1869_v59, %v955_v58 }
 0x373   : > { %v957_v62 = vadd.f32 %v1871_v61, %v956_v60 }
 0x375   : > { %v958_v0 = vadd.f32 %v1873_v63, %v957_v62 }
 0x377   : > { %v959_v2 = vrot.slane %v958_v0, 4 }
 0x379   : > { %v960_v3 = vadd.f32 %v959_v2, %v958_v0 }
 0x37b   : > { %v961_v4 = vrot.slane %v960_v3, 2 }
 0x37d   : > { %v962_v7 = vadd.f32 %v961_v4, %v960_v3 }
 0x37f   : > { %v963_v8 = vrot.slane %v962_v7, 1 }
 0x381   : > { %v964_v46 = vadd.f32 %v963_v8, %v962_v7 }
 0x383   : > { %1874 = vrcp.f32 %v964_v46 }
 0x38d   : > { %v1875_v52 = vpop.eup %1874 }
 0x38e   : > { %v966_v40 = vmul.f32 %v1875_v52, %v1843_v15  ;;  %v967_v49 = vmul.f32 %v1875_v52, %v1845_v19  ;;  %v968_v47 = vmul.f32 %v1875_v52, %v1847_v22  ;;  %v969_v54 = vmul.f32 %v1875_v52, %v1849_v26 }
 0x38f   : > { %v970_v42 = vmul.f32 %v1875_v52, %v1851_v29  ;;  %v971_v51 = vmul.f32 %v1875_v52, %v1853_v32  ;;  %v972_v6 = vmul.f32 %v1875_v52, %v1855_v35  ;;  %v973_v9 = vmul.f32 %v1875_v52, %v1857_v38 }
 0x390   : > { %v982_v12 = vpack.c.bf16 %v967_v49, %v966_v40  ;;  %v983_v1 = vpack.c.bf16 %v969_v54, %v968_v47  ;;  %v974_v10 = vmul.f32 %v1875_v52, %v1859_v43  ;;  %v975_v13 = vmul.f32 %v1875_v52, %v1861_v24 }
 0x391   : > { %v984_v16 = vpack.c.bf16 %v971_v51, %v970_v42  ;;  %v985_v17 = vpack.c.bf16 %v973_v9, %v972_v6  ;;  %v976_v18 = vmul.f32 %v1875_v52, %v1863_v50  ;;  %v977_v20 = vmul.f32 %v1875_v52, %v1865_v55 }
 0x392   : > { %1660 = vmatprep.subr.bf16.mxu0 %v982_v12  ;;  %v986_v21 = vpack.c.bf16 %v975_v13, %v974_v10  ;;  %v978_v23 = vmul.f32 %v1875_v52, %v1867_v57  ;;  %v979_v25 = vmul.f32 %v1875_v52, %v1869_v59  ;;  %v980_v15 = vmul.f32 %v1875_v52, %v1871_v61 }
 0x393   : > { %1661 = vmatpush3.bf16.msra.mxu0 %v982_v12  ;;  %v987_v19 = vpack.c.bf16 %v977_v20, %v976_v18  ;;  %v981_v22 = vmul.f32 %v1875_v52, %v1873_v63 }
 0x394   : > { %1662 = vmatprep.subr.bf16.mxu0 %v983_v1  ;;  %v988_v26 = vpack.c.bf16 %v979_v25, %v978_v23 }
 0x395   : > { %v989_v27 = vpack.c.bf16 %v981_v22, %v980_v15 }
 0x397   : > { %1663 = vmatpush3.bf16.msra.mxu0 %v983_v1 }
 0x398   : > { %1664 = vmatprep.subr.bf16.mxu0 %v984_v16 }
 0x39b   : > { %1665 = vmatpush3.bf16.msra.mxu0 %v984_v16 }
 0x39c   : > { %1666 = vmatprep.subr.bf16.mxu0 %v985_v17 }
 0x39f   : > { %1667 = vmatpush3.bf16.msra.mxu0 %v985_v17 }
 0x3a0   : > { %1668 = vmatprep.subr.bf16.mxu0 %v986_v21 }
 0x3a3   : > { %1669 = vmatpush3.bf16.msra.mxu0 %v986_v21 }
 0x3a4   : > { %1670 = vmatprep.subr.bf16.mxu0 %v987_v19 }
 0x3a7   : > { %1671 = vmatpush3.bf16.msra.mxu0 %v987_v19 }
 0x3a8   : > { %1672 = vmatprep.subr.bf16.mxu0 %v988_v26 }
 0x3ab   : > { %1673 = vmatpush3.bf16.msra.mxu0 %v988_v26 }
 0x3ac   : > { %1674 = vmatprep.subr.bf16.mxu0 %v989_v27 }
 0x3af   : > { %1675 = vmatpush3.bf16.msra.mxu0 %v989_v27 }
 0x3b2   : > { %1677 = vmatmul.mubr.bf16.vlgmr.msra.gmra.mrb[20].mxu0 %v1104_v14 }
 0x485   : > { %v1678_v29 = vpop.f32.mrb[20].mxu0 }
 0x486   : > { %v1139_v30 = vpop.f32.mrb[21].mxu0 }
 0x487   : > { %v1679_v31 = vpop.f32.mrb[22].mxu0 }
 0x488   : > { %v1155_v32 = vpack.c.bf16 %v1679_v31, %v1678_v29  ;;  %v1142_v33 = vpop.f32.mrb[23].mxu0 }
 0x489   : > { %v1154_v34 = vpack.c.bf16 %v1142_v33, %v1139_v30 }
 0x48b   : > { %1696 = vmatprep.mubr.bf16.mxu1 %v1154_v34 }
 0x48c   : > { %1697 = vmatmul.mubr.bf16.vlgmr.msra.gmra.mrb[8].mxu1 %v1155_v32 }
 0x55f   : > { %v1698_v35 = vpop.f32.mrb[8].mxu1 }
 0x560   : > { %v1261_v5 = vpop.f32.mrb[9].mxu1  ;;  %v1270_v14 = vadd.f32 %v1698_v35, %v1485_v36 }
 0x561   : > { %v1699_v11 = vpop.f32.mrb[10].mxu1  ;;  %v1262_v39 = vadd.f32 %v1485_v36, %v1261_v5 }
 0x562   : > { %v1273_v37 = vadd.f32 %v1699_v11, %v1485_v36  ;;  %v1264_v38 = vpop.f32.mrb[11].mxu1 }
 0x563   : > { %v1265_v41 = vadd.f32 %v1485_v36, %v1264_v38 }
 0x564   : > { %v1517_v43 = vpack.c.bf16 %v1273_v37, %v1270_v14 }
 0x565   : > { %v1512_v44 = vpack.c.bf16 %v1265_v41, %v1262_v39 }
 0x566   : > { %1519 = vst [vmem:[%s396_s20 + $0x8] sm:$0xff] %v1517_v43  }
 0x567   : > { %1513 = vst [vmem:[%s396_s20] sm:$0xff] %v1512_v44  }
 0x568   : > { %2059 = shalt.err (!%p2056_p8)
}
 0x569   : > { %s2060_s13 = scalar_lea.hbm %s2592_s9, 256  ;;  %s2064_s20 = scalar_lea.hbm %s2644_s8, 512 }
 0x56a   : > { %p2061_p6 = scmp.ne.s32.totalorder %s2592_s9, %s2060_s13  ;;  %p2065_p3 = scmp.lt.u32.totalorder %s2592_s9, %s2644_s8 }
 0x56b   : > { %p2066_p5 = scmp.lt.u32.totalorder %s2064_s20, %s2060_s13  ;;  %p2068_p7 = scmp.lt.u32.totalorder %s2060_s13, %s2592_s9 }
 0x56c   : > { %p2062_p10 = pnand %p2061_p6, %p2667_p4 }
 0x56d   : > { %p2067_p9 = por %p2066_p5, %p2065_p3 }
 0x56e   : > { %p2063_p11 = pneg %p2062_p10 }
 0x56f   : > { %p2069_p12 = por %p2068_p7, %p2067_p9 }
 0x571   : > { %p2070_p1 = pnand %p2069_p12, %p2063_p11 }
 0x573   : > { %2073 = shalt.err (!%p2070_p1)
}
 0x574   : > { %s2137_s23 = smov 64   ;;  %s2138_s25 = smov 4  }
 0x575   : > { %1722 = dma.vmem_to_hbm [thread:$0]  (%p2667_p4), %s2587_s22, 256, %s2592_s9, %s1297_s1, %s2137_s23, %s2137_s23, %s2138_s25  }
 0x576 PF: > { %s1325_s11 = sand.u32 1, %s2112_s27   ;;  %p2668_p13 = scmp.ne.s32.totalorder %s2657_s26, 0 }
 0x577   : > { %p2669_p0 = scmp.ge.s32.totalorder %s2124_s30, 2  ;;  %s1326_s16 = scalar_lea.sflag [#allocation4], %s1325_s11 }
 0x579   : > { %p1745_p2 = pnand %p2669_p0, %p2668_p13 }
 0x57b   : > { %2107 = dma.done.wait (!%p1745_p2), %s1326_s16, 256  }
 0x57c   : > { %2109 = vsyncadd (!%p1745_p2), %s1326_s16, 4294967040  ;;  %p24_p8 = scmp.ge.s32.totalorder %s2354_s18, 4   ;;  %s2670_s27 = smov %s2116_s28 }
 0x57d   : > { %s2671_s28 = smov %s2120_s29  ;;  %s2672_s29 = smov %s2366_s24 }
 0x57e   : > { %s2673_s30 = smov %s2354_s18  ;;  %26 = sbr.rel (!%p24_p8) target bundleno = 10 (0xa), region = 117 }
 0x585   :  { %1331 = vsyncpa [#allocation3], 1 }
 0x586   :  { %1333 = vsyncpa [#allocation3 + $0x1], 1 }
 0x587   :  { %1334 = vsyncpa [#allocation6], 1 }
 0x588   :  { %1335 = vsyncpa [#allocation9], 1 }
 0x589   :  { %1336 = vsyncpa [#allocation12], 1 }
 0x58a   :  { %1337 = vsyncpa [#allocation4], 1 }
 0x58b   :  { %1339 = vsyncpa [#allocation4 + $0x1], 1 }

</bundles_post_ra>
